<compile_context>
chip_gen: v7x
topology: tpu7x:2x2x1
jax: 0.10.0
libtpu: 0.0.40
codegen_flags: <defaults>
</compile_context>

<pallas_src>
import jax
import jax.numpy as jnp
from jax.experimental import pallas as pl
from jax.experimental.pallas import tpu as pltpu


LANE = 128


def _round_up(n, m):
    return ((n + m - 1) // m) * m


# -----------------------------------------------------------------------------
# Kernel: the whole 4-layer MLP fused into one Pallas body; tiled over batch.
# -----------------------------------------------------------------------------
def deep_mlp_kernel(x_ref,
                    w1_ref, b1_ref,
                    w2_ref, b2_ref,
                    w3_ref, b3_ref,
                    w4_ref, b4_ref,
                    o_ref):
    x = x_ref[...]                                                      # (TB, 784) bf16

    h = jnp.dot(x, w1_ref[...], preferred_element_type=jnp.float32)    # (TB, 640) f32
    h = jnp.maximum(h + b1_ref[...], 0.0).astype(jnp.bfloat16)

    h = jnp.dot(h, w2_ref[...], preferred_element_type=jnp.float32)    # (TB, 640)
    h = jnp.maximum(h + b2_ref[...], 0.0).astype(jnp.bfloat16)

    h = jnp.dot(h, w3_ref[...], preferred_element_type=jnp.float32)    # (TB, 128) lane-padded
    h = jnp.maximum(h + b3_ref[...], 0.0).astype(jnp.bfloat16)

    out = jnp.dot(h, w4_ref[...], preferred_element_type=jnp.float32)  # (TB, 128) lane-padded
    o_ref[...] = (out + b4_ref[...]).astype(o_ref.dtype)


# -----------------------------------------------------------------------------
# Wrapper
# -----------------------------------------------------------------------------
def deep_forward(x_nchw, params, *, batch_tile=256):
    """Run the Deep MLP forward pass.

    x_nchw: (B, 1, 28, 28) float32, NCHW like PyTorch.
    params: dict with w1..w4 (PyTorch layout: (out, in)) and b1..b4 (out,).
    """
    B = x_nchw.shape[0]
    # nn.Flatten (start_dim=1): row-major collapse of C,H,W.
    x = x_nchw.reshape(B, -1).astype(jnp.float32)                       # (B, 784)
    d_in = x.shape[1]

    # Pre-transpose weights to (in, out); cast to bf16 for the MXU.  Lane-pad
    # the narrow tail layers (60, 10) up to 128 with zeros so the last two
    # matmuls and the output store are full-lane.
    d3 = params["w3"].shape[0]                    # 60
    d4 = params["w4"].shape[0]                    # 10
    d3p = _round_up(d3, LANE)                     # 128
    d4p = _round_up(d4, LANE)                     # 128

    w1t = params["w1"].T.astype(jnp.bfloat16)     # (784, 640)
    w2t = params["w2"].T.astype(jnp.bfloat16)     # (640, 640)
    w3t = jnp.zeros((params["w3"].shape[1], d3p), jnp.bfloat16).at[:, :d3].set(
        params["w3"].T.astype(jnp.bfloat16))      # (640, 128)
    w4t = jnp.zeros((d3p, d4p), jnp.bfloat16).at[:d3, :d4].set(
        params["w4"].T.astype(jnp.bfloat16))      # (128, 128)

    # Biases stay f32 (epilogue math is f32); padded lanes are zero.
    b1 = params["b1"].reshape(1, -1).astype(jnp.float32)
    b2 = params["b2"].reshape(1, -1).astype(jnp.float32)
    b3 = jnp.zeros((1, d3p), jnp.float32).at[:, :d3].set(
        params["b3"].reshape(1, -1).astype(jnp.float32))
    b4 = jnp.zeros((1, d4p), jnp.float32).at[:, :d4].set(
        params["b4"].reshape(1, -1).astype(jnp.float32))

    # Batch tiling: large MXU-friendly tiles; pad ragged batches with zero rows.
    tile = min(_round_up(batch_tile, 16), _round_up(B, 16))
    B_pad = _round_up(B, tile)
    xp = x
    if B_pad != B:
        xp = jnp.zeros((B_pad, d_in), jnp.float32).at[:B].set(x)
    xp = xp.astype(jnp.bfloat16)

    grid = (B_pad // tile,)
    full = lambda arr: pl.BlockSpec(arr.shape, lambda i: (0, 0))

    # Advisory cost estimate so XLA can overlap this kernel with neighbors.
    flops = 2 * B_pad * (d_in * 640 + 640 * 640 + 640 * d3p + d3p * d4p)
    bytes_accessed = (
        xp.size * 2
        + (w1t.size + w2t.size + w3t.size + w4t.size) * 2
        + (b1.size + b2.size + b3.size + b4.size) * 4
        + B_pad * d4p * 4)

    # NOTE: weights are grid-invariant; default (double) buffering is kept
    # because total VMEM use is <6 MB — well under every chip's scoped limit.
    out_padded = pl.pallas_call(
        deep_mlp_kernel,
        out_shape=jax.ShapeDtypeStruct((B_pad, d4p), jnp.float32),
        grid_spec=pltpu.PrefetchScalarGridSpec(
            num_scalar_prefetch=0,
            grid=grid,
            in_specs=[
                pl.BlockSpec((tile, d_in), lambda i: (i, 0)),   # x tile
                full(w1t), full(b1),
                full(w2t), full(b2),
                full(w3t), full(b3),
                full(w4t), full(b4),
            ],
            out_specs=pl.BlockSpec((tile, d4p), lambda i: (i, 0)),
        ),
        compiler_params=pltpu.CompilerParams(
            dimension_semantics=("parallel",),
        ),
        cost_estimate=pl.CostEstimate(
            flops=flops, transcendentals=0, bytes_accessed=bytes_accessed),
    )(xp, w1t, b1, w2t, b2, w3t, b3, w4t, b4)

    # Drop padded batch rows and padded output lanes.
    return out_padded[:B, :d4]


# -----------------------------------------------------------------------------
# Deterministic parameter init matching nn.Linear's default scheme
# (uniform(-1/sqrt(fan_in), 1/sqrt(fan_in)) for both weight and bias).
# -----------------------------------------------------------------------------
def init_params(key, layers=(28 * 28, 640, 640, 60, 10)):
    params = {}
    dims = list(zip(layers[:-1], layers[1:]))
    for idx, (fan_in, fan_out) in enumerate(dims, start=1):
        key, kw, kb = jax.random.split(key, 3)
        bound = 1.0 / jnp.sqrt(jnp.float32(fan_in))
        params[f"w{idx}"] = jax.random.uniform(
            kw, (fan_out, fan_in), jnp.float32, -bound, bound)   # PyTorch (out, in)
        params[f"b{idx}"] = jax.random.uniform(
            kb, (fan_out,), jnp.float32, -bound, bound)
    return params


def reference_forward_f32(x_nchw, params):
    """Plain-JAX f32 reference mirroring the PyTorch forward."""
    x = x_nchw.reshape(x_nchw.shape[0], -1)
    h = jnp.maximum(x @ params["w1"].T + params["b1"], 0.0)
    h = jnp.maximum(h @ params["w2"].T + params["b2"], 0.0)
    h = jnp.maximum(h @ params["w3"].T + params["b3"], 0.0)
    return h @ params["w4"].T + params["b4"]


def reference_forward_bf16(x_nchw, params):
    """Reference with the same bf16-matmul / f32-accumulate recipe as the kernel."""
    def lin(h, w, b):
        return jnp.dot(h, w.T.astype(jnp.bfloat16),
                       preferred_element_type=jnp.float32) + b
    x = x_nchw.reshape(x_nchw.shape[0], -1).astype(jnp.bfloat16)
    h = jnp.maximum(lin(x, params["w1"], params["b1"]), 0.0).astype(jnp.bfloat16)
    h = jnp.maximum(lin(h, params["w2"], params["b2"]), 0.0).astype(jnp.bfloat16)
    h = jnp.maximum(lin(h, params["w3"], params["b3"]), 0.0).astype(jnp.bfloat16)
    return lin(h, params["w4"], params["b4"])


if __name__ == "__main__":
    key = jax.random.PRNGKey(0)
    key, kx = jax.random.split(key)

    B = 8
    x = jax.random.normal(kx, (B, 1, 28, 28), jnp.float32)   # NCHW, like MNIST batch
    params = init_params(key)

    out = deep_forward(x, params)
    out = jax.block_until_ready(out)
    assert out.shape == (B, 10), out.shape

    # Tight check vs a reference using the identical mixed-precision recipe.
    ref_bf16 = reference_forward_bf16(x, params)
    assert jnp.allclose(out, ref_bf16, atol=2e-3, rtol=2e-3), "mismatch vs bf16 reference"

    # Loose check vs the full-f32 PyTorch-equivalent reference.
    ref_f32 = reference_forward_f32(x, params)
    assert jnp.allclose(out, ref_f32, atol=2e-2, rtol=2e-2), "mismatch vs f32 reference"

    print("KERNEL_OK")
</pallas_src>

<mosaic_0001>
module attributes {stable_mosaic.version = 11 : i64} {
  func.func @deep_mlp_kernel(%arg0: i32, %arg1: memref<16x784xbf16, #tpu.memory_space<vmem>>, %arg2: memref<784x640xbf16, #tpu.memory_space<vmem>>, %arg3: memref<1x640xf32, #tpu.memory_space<vmem>>, %arg4: memref<640x640xbf16, #tpu.memory_space<vmem>>, %arg5: memref<1x640xf32, #tpu.memory_space<vmem>>, %arg6: memref<640x128xbf16, #tpu.memory_space<vmem>>, %arg7: memref<1x128xf32, #tpu.memory_space<vmem>>, %arg8: memref<128x128xbf16, #tpu.memory_space<vmem>>, %arg9: memref<1x128xf32, #tpu.memory_space<vmem>>, %arg10: memref<16x128xf32, #tpu.memory_space<vmem>>) attributes {dimension_semantics = [#tpu.dimension_semantics<parallel>], iteration_bounds = array<i64: 1>, scalar_prefetch = 0 : i64, scratch_operands = 0 : i64, tpu.core_type = #tpu.core_type<tc>, window_params = [{transform_indices = @transform_0, window_bounds = array<i64: 16, 784>}, {pipeline_mode = #tpu.pipeline_mode<synchronous>, transform_indices = @transform_1, window_bounds = array<i64: 784, 640>}, {pipeline_mode = #tpu.pipeline_mode<synchronous>, transform_indices = @transform_2, window_bounds = array<i64: 1, 640>}, {pipeline_mode = #tpu.pipeline_mode<synchronous>, transform_indices = @transform_3, window_bounds = array<i64: 640, 640>}, {pipeline_mode = #tpu.pipeline_mode<synchronous>, transform_indices = @transform_4, window_bounds = array<i64: 1, 640>}, {pipeline_mode = #tpu.pipeline_mode<synchronous>, transform_indices = @transform_5, window_bounds = array<i64: 640, 128>}, {pipeline_mode = #tpu.pipeline_mode<synchronous>, transform_indices = @transform_6, window_bounds = array<i64: 1, 128>}, {pipeline_mode = #tpu.pipeline_mode<synchronous>, transform_indices = @transform_7, window_bounds = array<i64: 128, 128>}, {pipeline_mode = #tpu.pipeline_mode<synchronous>, transform_indices = @transform_8, window_bounds = array<i64: 1, 128>}, {transform_indices = @transform_9, window_bounds = array<i64: 16, 128>}]} {
    %c0 = arith.constant 0 : index
    %c0_0 = arith.constant 0 : index
    %0 = vector.load %arg1[%c0, %c0_0] : memref<16x784xbf16, #tpu.memory_space<vmem>>, vector<16x784xbf16>
    %c0_1 = arith.constant 0 : index
    %c0_2 = arith.constant 0 : index
    %1 = vector.load %arg2[%c0_1, %c0_2] : memref<784x640xbf16, #tpu.memory_space<vmem>>, vector<784x640xbf16>
    %cst = arith.constant dense<0.000000e+00> : vector<16x640xf32>
    %2 = tpu.matmul %0, %1, %cst {dimension_numbers = #tpu.dot_dimension_numbers<[1], [0], [0], [1], [0, 0, 1, 1], [], []>} : vector<16x784xbf16>, vector<784x640xbf16>, vector<16x640xf32> -> vector<16x640xf32>
    %c0_3 = arith.constant 0 : index
    %c0_4 = arith.constant 0 : index
    %3 = vector.load %arg3[%c0_3, %c0_4] : memref<1x640xf32, #tpu.memory_space<vmem>>, vector<1x640xf32>
    %4 = vector.broadcast %3 : vector<1x640xf32> to vector<16x640xf32>
    %5 = arith.addf %2, %4 : vector<16x640xf32>
    %cst_5 = arith.constant 0.000000e+00 : f32
    %6 = vector.broadcast %cst_5 : f32 to vector<16x640xf32>
    %7 = arith.maximumf %5, %6 : vector<16x640xf32>
    %8 = arith.truncf %7 : vector<16x640xf32> to vector<16x640xbf16>
    %c0_6 = arith.constant 0 : index
    %c0_7 = arith.constant 0 : index
    %9 = vector.load %arg4[%c0_6, %c0_7] : memref<640x640xbf16, #tpu.memory_space<vmem>>, vector<640x640xbf16>
    %cst_8 = arith.constant dense<0.000000e+00> : vector<16x640xf32>
    %10 = tpu.matmul %8, %9, %cst_8 {dimension_numbers = #tpu.dot_dimension_numbers<[1], [0], [0], [1], [0, 0, 1, 1], [], []>} : vector<16x640xbf16>, vector<640x640xbf16>, vector<16x640xf32> -> vector<16x640xf32>
    %c0_9 = arith.constant 0 : index
    %c0_10 = arith.constant 0 : index
    %11 = vector.load %arg5[%c0_9, %c0_10] : memref<1x640xf32, #tpu.memory_space<vmem>>, vector<1x640xf32>
    %12 = vector.broadcast %11 : vector<1x640xf32> to vector<16x640xf32>
    %13 = arith.addf %10, %12 : vector<16x640xf32>
    %cst_11 = arith.constant 0.000000e+00 : f32
    %14 = vector.broadcast %cst_11 : f32 to vector<16x640xf32>
    %15 = arith.maximumf %13, %14 : vector<16x640xf32>
    %16 = arith.truncf %15 : vector<16x640xf32> to vector<16x640xbf16>
    %c0_12 = arith.constant 0 : index
    %c0_13 = arith.constant 0 : index
    %17 = vector.load %arg6[%c0_12, %c0_13] : memref<640x128xbf16, #tpu.memory_space<vmem>>, vector<640x128xbf16>
    %cst_14 = arith.constant dense<0.000000e+00> : vector<16x128xf32>
    %18 = tpu.matmul %16, %17, %cst_14 {dimension_numbers = #tpu.dot_dimension_numbers<[1], [0], [0], [1], [0, 0, 1, 1], [], []>} : vector<16x640xbf16>, vector<640x128xbf16>, vector<16x128xf32> -> vector<16x128xf32>
    %c0_15 = arith.constant 0 : index
    %c0_16 = arith.constant 0 : index
    %19 = vector.load %arg7[%c0_15, %c0_16] : memref<1x128xf32, #tpu.memory_space<vmem>>, vector<1x128xf32>
    %20 = vector.broadcast %19 : vector<1x128xf32> to vector<16x128xf32>
    %21 = arith.addf %18, %20 : vector<16x128xf32>
    %cst_17 = arith.constant 0.000000e+00 : f32
    %22 = vector.broadcast %cst_17 : f32 to vector<16x128xf32>
    %23 = arith.maximumf %21, %22 : vector<16x128xf32>
    %24 = arith.truncf %23 : vector<16x128xf32> to vector<16x128xbf16>
    %c0_18 = arith.constant 0 : index
    %c0_19 = arith.constant 0 : index
    %25 = vector.load %arg8[%c0_18, %c0_19] : memref<128x128xbf16, #tpu.memory_space<vmem>>, vector<128x128xbf16>
    %cst_20 = arith.constant dense<0.000000e+00> : vector<16x128xf32>
    %26 = tpu.matmul %24, %25, %cst_20 {dimension_numbers = #tpu.dot_dimension_numbers<[1], [0], [0], [1], [0, 0, 1, 1], [], []>} : vector<16x128xbf16>, vector<128x128xbf16>, vector<16x128xf32> -> vector<16x128xf32>
    %c0_21 = arith.constant 0 : index
    %c0_22 = arith.constant 0 : index
    %27 = vector.load %arg9[%c0_21, %c0_22] : memref<1x128xf32, #tpu.memory_space<vmem>>, vector<1x128xf32>
    %28 = vector.broadcast %27 : vector<1x128xf32> to vector<16x128xf32>
    %29 = arith.addf %26, %28 : vector<16x128xf32>
    %c0_23 = arith.constant 0 : index
    %c0_24 = arith.constant 0 : index
    %30 = vector.load %arg10[%c0_23, %c0_24] : memref<16x128xf32, #tpu.memory_space<vmem>>, vector<16x128xf32>
    tpu.vector_store %arg10[%c0_23, %c0_24], %29 {strides = array<i32>} : memref<16x128xf32, #tpu.memory_space<vmem>>, vector<16x128xf32>,
    return
  }
  func.func @transform_0(%arg0: i32) -> (i32, i32) {
    %c0_i32 = arith.constant 0 : i32
    %c0_i32_0 = arith.constant 0 : i32
    return %arg0, %c0_i32 : i32, i32
  }
  func.func @transform_1(%arg0: i32) -> (i32, i32) {
    %c0_i32 = arith.constant 0 : i32
    %c0_i32_0 = arith.constant 0 : i32
    %c0_i32_1 = arith.constant 0 : i32
    return %c0_i32, %c0_i32_0 : i32, i32
  }
  func.func @transform_2(%arg0: i32) -> (i32, i32) {
    %c0_i32 = arith.constant 0 : i32
    %c0_i32_0 = arith.constant 0 : i32
    %c0_i32_1 = arith.constant 0 : i32
    return %c0_i32, %c0_i32_0 : i32, i32
  }
  func.func @transform_3(%arg0: i32) -> (i32, i32) {
    %c0_i32 = arith.constant 0 : i32
    %c0_i32_0 = arith.constant 0 : i32
    %c0_i32_1 = arith.constant 0 : i32
    return %c0_i32, %c0_i32_0 : i32, i32
  }
  func.func @transform_4(%arg0: i32) -> (i32, i32) {
    %c0_i32 = arith.constant 0 : i32
    %c0_i32_0 = arith.constant 0 : i32
    %c0_i32_1 = arith.constant 0 : i32
    return %c0_i32, %c0_i32_0 : i32, i32
  }
  func.func @transform_5(%arg0: i32) -> (i32, i32) {
    %c0_i32 = arith.constant 0 : i32
    %c0_i32_0 = arith.constant 0 : i32
    %c0_i32_1 = arith.constant 0 : i32
    return %c0_i32, %c0_i32_0 : i32, i32
  }
  func.func @transform_6(%arg0: i32) -> (i32, i32) {
    %c0_i32 = arith.constant 0 : i32
    %c0_i32_0 = arith.constant 0 : i32
    %c0_i32_1 = arith.constant 0 : i32
    return %c0_i32, %c0_i32_0 : i32, i32
  }
  func.func @transform_7(%arg0: i32) -> (i32, i32) {
    %c0_i32 = arith.constant 0 : i32
    %c0_i32_0 = arith.constant 0 : i32
    %c0_i32_1 = arith.constant 0 : i32
    return %c0_i32, %c0_i32_0 : i32, i32
  }
  func.func @transform_8(%arg0: i32) -> (i32, i32) {
    %c0_i32 = arith.constant 0 : i32
    %c0_i32_0 = arith.constant 0 : i32
    %c0_i32_1 = arith.constant 0 : i32
    return %c0_i32, %c0_i32_0 : i32, i32
  }
  func.func @transform_9(%arg0: i32) -> (i32, i32) {
    %c0_i32 = arith.constant 0 : i32
    %c0_i32_0 = arith.constant 0 : i32
    return %arg0, %c0_i32 : i32, i32
  }
}

</mosaic_0001>

<bundles_post_ra>
// kernel: tpu_custom_call.1
= control target key start
LH: loop header
LB: loop body
LE: loop exit
PB: predicated region body
PF: predicated region fallthrough
CT: control target
= control target key end

     0   :  { %14 = vsyncpa [#allocation3], 0  ;;  %s6505_s0 = inlined_call_operand.hbm [shape: bf16[16,784], index: 0, kind: input, shape index: {}]   ;;  %s6506_s1 = inlined_call_operand.hbm [shape: bf16[784,640], index: 1, kind: input, shape index: {}]   ;;  %s6507_s2 = inlined_call_operand.vmem [shape: f32[1,640], index: 2, kind: input, shape index: {}]   ;;  %s6508_s3 = inlined_call_operand.hbm [shape: bf16[640,640], index: 3, kind: input, shape index: {}]   ;;  %s6509_s4 = inlined_call_operand.vmem [shape: f32[1,640], index: 4, kind: input, shape index: {}]   ;;  %s6510_s5 = inlined_call_operand.hbm [shape: bf16[640,128], index: 5, kind: input, shape index: {}]   ;;  %s6511_s6 = inlined_call_operand.vmem [shape: f32[1,128], index: 6, kind: input, shape index: {}]   ;;  %s6512_s7 = inlined_call_operand.hbm [shape: bf16[128,128], index: 7, kind: input, shape index: {}]   ;;  %s6513_s8 = inlined_call_operand.vmem [shape: f32[1,128], index: 8, kind: input, shape index: {}]   ;;  %s6514_s9 = inlined_call_operand.hbm [shape: f32[16,128], index: 9, kind: output, shape index: {}]  }
   0x1   :  { %15 = vsyncpa [#allocation6], 0 }
   0x2   :  { %16 = vsyncpa [#allocation9], 0 }
   0x3   :  { %17 = vsyncpa [#allocation4], 0  ;;  %s6206_s30 = smov [#allocation5]   ;;  %s6066_s13 = scalar_lea.hbm %s6506_s1, 31360 }
   0x4   :  { %s35_s10 = sshll.u32 %s6206_s30, 4  ;;  %p6067_p0 = scmp.ne.s32.totalorder %s6506_s1, %s6066_s13  ;;  %s36_s10 = int_to_ptr.vmem [resolvable:$true] %s35_s10 }
   0x5   :  { %p6070_p1 = scmp.lt.u32.totalorder %s6066_s13, %s6506_s1 }
   0x7   :  { %p6072_p2 = pnand %p6070_p1, %p6067_p0 }
   0x9   :  { %6075 = shalt.err (!%p6072_p2)
}
   0xa   :  { %s6076_s18 = scalar_lea.vmem %s36_s10, 31360  ;;  %p6081_p4 = scmp.lt.s32.totalorder %s36_s10, %s36_s10 }
   0xb   :  { %p6077_p3 = scmp.ne.s32.totalorder %s36_s10, %s6076_s18  ;;  %p6082_p5 = scmp.lt.s32.totalorder %s6076_s18, %s6076_s18 }
   0xd   :  { %p6083_p6 = por %p6082_p5, %p6081_p4 }
   0xf   :  { %p6084_p7 = pnand %p6083_p6, %p6077_p3 }
  0x11   :  { %6087 = shalt.err (!%p6084_p7)
}
  0x12   :  { %s6207_s19 = smov 320   ;;  %s6208_s20 = smov 20  }
  0x13   :  { %41 = dma.hbm_to_vmem [thread:$0]  %s6506_s1, 31360, %s36_s10, [#allocation6], %s6207_s19, %s6207_s19, %s6208_s20  }
  0x14   :  { %s6209_s23 = smov [#allocation8]   ;;  %s6088_s27 = scalar_lea.hbm %s6510_s5, 5120 }
  0x15   :  { %s63_s24 = sshll.u32 %s6209_s23, 4  ;;  %p6089_p8 = scmp.ne.s32.totalorder %s6510_s5, %s6088_s27  ;;  %s64_s24 = int_to_ptr.vmem [resolvable:$true] %s63_s24 }
  0x16   :  { %p6092_p9 = scmp.lt.u32.totalorder %s6088_s27, %s6510_s5 }
  0x18   :  { %p6094_p10 = pnand %p6092_p9, %p6089_p8 }
  0x1a   :  { %6097 = shalt.err (!%p6094_p10)
}
  0x1b   :  { %s6098_s12 = scalar_lea.vmem %s64_s24, 5120  ;;  %p6103_p12 = scmp.lt.s32.totalorder %s64_s24, %s64_s24 }
  0x1c   :  { %p6099_p11 = scmp.ne.s32.totalorder %s64_s24, %s6098_s12  ;;  %p6104_p13 = scmp.lt.s32.totalorder %s6098_s12, %s6098_s12 }
  0x1e   :  { %p6105_p0 = por %p6104_p13, %p6103_p12 }
  0x20   :  { %p6106_p1 = pnand %p6105_p0, %p6099_p11 }
  0x22   :  { %6109 = shalt.err (!%p6106_p1)
}
  0x23   :  { %s6210_s1 = smov 64   ;;  %s6211_s10 = smov 4  }
  0x24   :  { %69 = dma.hbm_to_vmem [thread:$0]  %s6510_s5, 5120, %s64_s24, [#allocation9], %s6210_s1, %s6210_s1, %s6211_s10  }
  0x25   :  { %s6212_s15 = smov [#allocation2]   ;;  %s6110_s21 = scalar_lea.hbm %s6505_s0, 896 }
  0x26   :  { %s23_s16 = sshll.u32 %s6212_s15, 4  ;;  %p6111_p2 = scmp.ne.s32.totalorder %s6505_s0, %s6110_s21  ;;  %s24_s16 = int_to_ptr.vmem [resolvable:$true] %s23_s16 }
  0x27   :  { %p6114_p3 = scmp.lt.u32.totalorder %s6110_s21, %s6505_s0 }
  0x29   :  { %p6116_p4 = pnand %p6114_p3, %p6111_p2 }
  0x2b   :  { %6119 = shalt.err (!%p6116_p4)
}
  0x2c   :  { %s6120_s27 = scalar_lea.vmem %s24_s16, 896  ;;  %p6125_p6 = scmp.lt.s32.totalorder %s24_s16, %s24_s16 }
  0x2d   :  { %p6121_p5 = scmp.ne.s32.totalorder %s24_s16, %s6120_s27  ;;  %p6126_p7 = scmp.lt.s32.totalorder %s6120_s27, %s6120_s27 }
  0x2f   :  { %p6127_p8 = por %p6126_p7, %p6125_p6 }
  0x31   :  { %p6128_p9 = pnand %p6127_p8, %p6121_p5 }
  0x33   :  { %6131 = shalt.err (!%p6128_p9)
}
  0x34   :  { %s6213_s5 = smov 448   ;;  %s6214_s24 = smov 28  }
  0x35   :  { %29 = dma.hbm_to_vmem [thread:$0]  %s6505_s0, 896, %s24_s16, [#allocation3], %s6213_s5, %s6213_s5, %s6214_s24  }
  0x36   :  { %s6215_s30 = smov [#allocation7]   ;;  %s6216_s12 = smov [#allocation10]  }
  0x37   :  { %s49_s11 = sshll.u32 %s6215_s30, 4  ;;  %s77_s13 = sshll.u32 %s6216_s12, 4  ;;  %s50_s11 = int_to_ptr.vmem [resolvable:$true] %s49_s11  ;;  %s78_s13 = int_to_ptr.vmem [resolvable:$true] %s77_s13 }
  0x38   :  { %s6132_s17 = scalar_lea.hbm %s6508_s3, 25600 }
  0x39   :  { %p6133_p10 = scmp.ne.s32.totalorder %s6508_s3, %s6132_s17  ;;  %p6136_p11 = scmp.lt.u32.totalorder %s6132_s17, %s6508_s3 }
  0x3b   :  { %p6138_p12 = pnand %p6136_p11, %p6133_p10 }
  0x3d   :  { %6141 = shalt.err (!%p6138_p12)
}
  0x3e   :  { %s6142_s0 = scalar_lea.vmem %s50_s11, 25600  ;;  %p6147_p0 = scmp.lt.s32.totalorder %s50_s11, %s50_s11 }
  0x3f   :  { %p6143_p13 = scmp.ne.s32.totalorder %s50_s11, %s6142_s0  ;;  %p6148_p1 = scmp.lt.s32.totalorder %s6142_s0, %s6142_s0 }
  0x41   :  { %p6149_p2 = por %p6148_p1, %p6147_p0 }
  0x43   :  { %p6150_p3 = pnand %p6149_p2, %p6143_p13 }
  0x45   :  { %6153 = shalt.err (!%p6150_p3)
}
  0x46   :  { %55 = dma.hbm_to_vmem [thread:$0]  %s6508_s3, 25600, %s50_s11, [#allocation6], %s6207_s19, %s6207_s19, %s6208_s20  }
  0x47   :  { %s6154_s5 = scalar_lea.hbm %s6512_s7, 1024 }
  0x48   :  { %p6155_p4 = scmp.ne.s32.totalorder %s6512_s7, %s6154_s5  ;;  %p6158_p5 = scmp.lt.u32.totalorder %s6154_s5, %s6512_s7 }
  0x4a   :  { %p6160_p6 = pnand %p6158_p5, %p6155_p4 }
  0x4c   :  { %6163 = shalt.err (!%p6160_p6)
}
  0x4d   :  { %s6164_s12 = scalar_lea.vmem %s78_s13, 1024  ;;  %p6169_p8 = scmp.lt.s32.totalorder %s78_s13, %s78_s13 }
  0x4e   :  { %p6165_p7 = scmp.ne.s32.totalorder %s78_s13, %s6164_s12  ;;  %p6170_p9 = scmp.lt.s32.totalorder %s6164_s12, %s6164_s12 }
  0x50   :  { %p6171_p10 = por %p6170_p9, %p6169_p8 }
  0x52   :  { %p6172_p11 = pnand %p6171_p10, %p6165_p7 }
  0x54   :  { %6175 = shalt.err (!%p6172_p11)
}
  0x55   :  { %83 = dma.hbm_to_vmem [thread:$0]  %s6512_s7, 1024, %s78_s13, [#allocation9], %s6210_s1, %s6210_s1, %s6211_s10  }
  0x56   :  { %6198 = dma.done.wait [#allocation3], 896  }
  0x57   :  { %6199 = vsyncadd [#allocation3], 4294966400 }
  0x58   :  { %6200 = dma.done.wait [#allocation6], 56960  }
  0x59   :  { %6201 = vsyncadd [#allocation6], 4294910336 }
  0x5a   :  { %6202 = dma.done.wait [#allocation9], 6144  }
  0x5b   :  { %6203 = vsyncadd [#allocation9], 4294961152  ;;  %v5383_v0 = vld [vmem:[#allocation5 + $0x4] ss:$20 sps:$4 sm:$0xff]   ;;  %v5385_v1 = vld [vmem:[#allocation5 + $0xc] ss:$20 sps:$4 sm:$0xff]  }
  0x5c   :  { %1744 = vmatprep.subr.bf16.mxu0 %v5383_v0  ;;  %v5387_v2 = vld [vmem:[#allocation5] ss:$20 sps:$4 sm:$0xff]   ;;  %v5388_v3 = vld [vmem:[#allocation5 + $0x8] ss:$20 sps:$4 sm:$0xff]   ;;  %1916 = vmatprep.subr.bf16.mxu1 %v5385_v1  ;;  %v5394_v7 = vld [vmem:[#allocation5 + $0x30] ss:$20 sps:$4 sm:$0xff]  }
  0x5d   :  { %v5389_v4 = vld [vmem:[#allocation5 + $0x2c] ss:$20 sps:$4 sm:$0xff]   ;;  %1745 = vmatpush1.bf16.msra.mxu0 %v5387_v2  ;;  %1917 = vmatpush1.bf16.msra.mxu1 %v5388_v3  ;;  %v5391_v5 = vld [vmem:[#allocation5 + $0x34] ss:$20 sps:$4 sm:$0xff]   ;;  %v5397_v9 = vld [vmem:[#allocation5 + $0x5c] ss:$20 sps:$4 sm:$0xff]  }
  0x5e   :  { %v5393_v6 = vld [vmem:[#allocation5 + $0x28] ss:$20 sps:$4 sm:$0xff]   ;;  %1746 = vmatprep.subr.bf16.mxu0 %v5389_v4  ;;  %1918 = vmatprep.subr.bf16.mxu1 %v5391_v5  ;;  %v5399_v10 = vld [vmem:[#allocation5 + $0x50] ss:$20 sps:$4 sm:$0xff]   ;;  %v5400_v11 = vld [vmem:[#allocation5 + $0x58] ss:$20 sps:$4 sm:$0xff]  }
  0x5f   :  { %v5395_v8 = vld [vmem:[#allocation5 + $0x54] ss:$20 sps:$4 sm:$0xff]   ;;  %v5401_v12 = vld [vmem:[#allocation5 + $0x7c] ss:$20 sps:$4 sm:$0xff]   ;;  %v5403_v13 = vld [vmem:[#allocation5 + $0x84] ss:$20 sps:$4 sm:$0xff]  }
  0x60   :  { %v5405_v14 = vld [vmem:[#allocation5 + $0x78] ss:$20 sps:$4 sm:$0xff]   ;;  %v5406_v15 = vld [vmem:[#allocation5 + $0x80] ss:$20 sps:$4 sm:$0xff]   ;;  %v5412_v19 = vld [vmem:[#allocation5 + $0xa8] ss:$20 sps:$4 sm:$0xff]  }
  0x61   :  { %1747 = vmatpush1.bf16.msra.mxu0 %v5393_v6  ;;  %1919 = vmatpush1.bf16.msra.mxu1 %v5394_v7  ;;  %v5407_v16 = vld [vmem:[#allocation5 + $0xa4] ss:$20 sps:$4 sm:$0xff]   ;;  %v5409_v17 = vld [vmem:[#allocation5 + $0xac] ss:$20 sps:$4 sm:$0xff]   ;;  %v5415_v21 = vld [vmem:[#allocation5 + $0xd4] ss:$20 sps:$4 sm:$0xff]  }
  0x62   :  { %1748 = vmatprep.subr.bf16.mxu0 %v5395_v8  ;;  %1920 = vmatprep.subr.bf16.mxu1 %v5397_v9  ;;  %v5411_v18 = vld [vmem:[#allocation5 + $0xa0] ss:$20 sps:$4 sm:$0xff]   ;;  %v5417_v22 = vld [vmem:[#allocation5 + $0xc8] ss:$20 sps:$4 sm:$0xff]   ;;  %v5418_v23 = vld [vmem:[#allocation5 + $0xd0] ss:$20 sps:$4 sm:$0xff]  }
  0x63   :  { %v5413_v20 = vld [vmem:[#allocation5 + $0xcc] ss:$20 sps:$4 sm:$0xff]   ;;  %v5419_v24 = vld [vmem:[#allocation5 + $0xf4] ss:$20 sps:$4 sm:$0xff]   ;;  %v5421_v25 = vld [vmem:[#allocation5 + $0xfc] ss:$20 sps:$4 sm:$0xff]  }
  0x64   :  { %v5423_v26 = vld [vmem:[#allocation5 + $0xf0] ss:$20 sps:$4 sm:$0xff]   ;;  %v5424_v27 = vld [vmem:[#allocation5 + $0xf8] ss:$20 sps:$4 sm:$0xff]   ;;  %v5430_v31 = vld [vmem:[#allocation5 + $0x120] ss:$20 sps:$4 sm:$0xff]  }
  0x65   :  { %1749 = vmatpush1.bf16.msra.mxu0 %v5399_v10  ;;  %1921 = vmatpush1.bf16.msra.mxu1 %v5400_v11  ;;  %v5425_v28 = vld [vmem:[#allocation5 + $0x11c] ss:$20 sps:$4 sm:$0xff]   ;;  %v5427_v29 = vld [vmem:[#allocation5 + $0x124] ss:$20 sps:$4 sm:$0xff]   ;;  %v5433_v33 = vld [vmem:[#allocation5 + $0x14c] ss:$20 sps:$4 sm:$0xff]  }
  0x66   :  { %1750 = vmatprep.subr.bf16.mxu0 %v5401_v12  ;;  %1922 = vmatprep.subr.bf16.mxu1 %v5403_v13  ;;  %v5429_v30 = vld [vmem:[#allocation5 + $0x118] ss:$20 sps:$4 sm:$0xff]   ;;  %v5435_v34 = vld [vmem:[#allocation5 + $0x140] ss:$20 sps:$4 sm:$0xff]   ;;  %v5436_v35 = vld [vmem:[#allocation5 + $0x148] ss:$20 sps:$4 sm:$0xff]  }
  0x67   :  { %v5431_v32 = vld [vmem:[#allocation5 + $0x144] ss:$20 sps:$4 sm:$0xff]   ;;  %v5437_v36 = vld [vmem:[#allocation5 + $0x16c] ss:$20 sps:$4 sm:$0xff]   ;;  %v5439_v37 = vld [vmem:[#allocation5 + $0x174] ss:$20 sps:$4 sm:$0xff]  }
  0x68   :  { %v5441_v38 = vld [vmem:[#allocation5 + $0x168] ss:$20 sps:$4 sm:$0xff]   ;;  %v5442_v39 = vld [vmem:[#allocation5 + $0x170] ss:$20 sps:$4 sm:$0xff]   ;;  %v5448_v43 = vld [vmem:[#allocation5 + $0x198] ss:$20 sps:$4 sm:$0xff]  }
  0x69   :  { %1751 = vmatpush1.bf16.msra.mxu0 %v5405_v14  ;;  %1923 = vmatpush1.bf16.msra.mxu1 %v5406_v15  ;;  %v5443_v40 = vld [vmem:[#allocation5 + $0x194] ss:$20 sps:$4 sm:$0xff]   ;;  %v5445_v41 = vld [vmem:[#allocation5 + $0x19c] ss:$20 sps:$4 sm:$0xff]   ;;  %v5451_v45 = vld [vmem:[#allocation5 + $0x1c4] ss:$20 sps:$4 sm:$0xff]  }
  0x6a   :  { %1752 = vmatprep.subr.bf16.mxu0 %v5407_v16  ;;  %1924 = vmatprep.subr.bf16.mxu1 %v5409_v17  ;;  %v5447_v42 = vld [vmem:[#allocation5 + $0x190] ss:$20 sps:$4 sm:$0xff]   ;;  %v5453_v46 = vld [vmem:[#allocation5 + $0x1b8] ss:$20 sps:$4 sm:$0xff]   ;;  %v5454_v48 = vld [vmem:[#allocation5 + $0x1c0] ss:$20 sps:$4 sm:$0xff]  }
  0x6b   :  { %v5449_v44 = vld [vmem:[#allocation5 + $0x1bc] ss:$20 sps:$4 sm:$0xff]   ;;  %v5479_v47 = vld [vmem:[#allocation2 + $0x4] ss:$28 sps:$4 sm:$0xff]   ;;  %v5455_v49 = vld [vmem:[#allocation5 + $0x1e4] ss:$20 sps:$4 sm:$0xff]  }
  0x6c   :  { %v5457_v50 = vld [vmem:[#allocation5 + $0x1ec] ss:$20 sps:$4 sm:$0xff]   ;;  %1776 = vmatprep.mubr.bf16.mxu0 %v5479_v47  ;;  %1948 = vmatprep.mubr.bf16.mxu1 %v5479_v47  ;;  %v5460_v52 = vld [vmem:[#allocation5 + $0x1e8] ss:$20 sps:$4 sm:$0xff]   ;;  %v5466_v56 = vld [vmem:[#allocation5 + $0x210] ss:$20 sps:$4 sm:$0xff]  }
  0x6d   :  { %1753 = vmatpush1.bf16.msra.mxu0 %v5411_v18  ;;  %1925 = vmatpush1.bf16.msra.mxu1 %v5412_v19  ;;  %v5459_v51 = vld [vmem:[#allocation5 + $0x1e0] ss:$20 sps:$4 sm:$0xff]   ;;  %v5465_v55 = vld [vmem:[#allocation5 + $0x208] ss:$20 sps:$4 sm:$0xff]   ;;  %v5471_v59 = vld [vmem:[#allocation5 + $0x230] ss:$20 sps:$4 sm:$0xff]  }
  0x6e   :  { %1754 = vmatprep.subr.bf16.mxu0 %v5413_v20  ;;  %1926 = vmatprep.subr.bf16.mxu1 %v5415_v21  ;;  %v5461_v53 = vld [vmem:[#allocation5 + $0x20c] ss:$20 sps:$4 sm:$0xff]   ;;  %v5463_v54 = vld [vmem:[#allocation5 + $0x214] ss:$20 sps:$4 sm:$0xff]   ;;  %v5469_v58 = vld [vmem:[#allocation5 + $0x23c] ss:$20 sps:$4 sm:$0xff]  }
  0x6f   :  { %v5467_v57 = vld [vmem:[#allocation5 + $0x234] ss:$20 sps:$4 sm:$0xff]   ;;  %v5472_v60 = vld [vmem:[#allocation5 + $0x238] ss:$20 sps:$4 sm:$0xff]   ;;  %v5473_v61 = vld [vmem:[#allocation5 + $0x25c] ss:$20 sps:$4 sm:$0xff]  }
  0x70   :  { %v5475_v62 = vld [vmem:[#allocation5 + $0x264] ss:$20 sps:$4 sm:$0xff]   ;;  %v5478_v0 = vld [vmem:[#allocation5 + $0x260] ss:$20 sps:$4 sm:$0xff]   ;;  %v5484_v4 = vld [vmem:[#allocation5 + $0x288] ss:$20 sps:$4 sm:$0xff]  }
  0x71   :  { %1755 = vmatpush1.bf16.msra.mxu0 %v5417_v22  ;;  %1927 = vmatpush1.bf16.msra.mxu1 %v5418_v23  ;;  %v5477_v63 = vld [vmem:[#allocation5 + $0x258] ss:$20 sps:$4 sm:$0xff]   ;;  %v5481_v3 = vld [vmem:[#allocation5 + $0x280] ss:$20 sps:$4 sm:$0xff]   ;;  %v5487_v5 = vld [vmem:[#allocation2] ss:$28 sps:$4 sm:$0xff]  }
  0x72   :  { %1756 = vmatprep.subr.bf16.mxu0 %v5419_v24  ;;  %1928 = vmatprep.subr.bf16.mxu1 %v5421_v25  ;;  %v5483_v1 = vld [vmem:[#allocation5 + $0x284] ss:$20 sps:$4 sm:$0xff]   ;;  %v5486_v2 = vld [vmem:[#allocation5 + $0x28c] ss:$20 sps:$4 sm:$0xff]   ;;  %v5493_v7 = vld [vmem:[#allocation5 + $0x2b4] ss:$20 sps:$4 sm:$0xff]  }
  0x73   :  { %v5490_v6 = vld [vmem:[#allocation5 + $0x2ac] ss:$20 sps:$4 sm:$0xff]   ;;  %v5488_v8 = vld [vmem:[#allocation5 + $0x2a8] ss:$20 sps:$4 sm:$0xff]   ;;  %v5491_v9 = vld [vmem:[#allocation5 + $0x2b0] ss:$20 sps:$4 sm:$0xff]  }
  0x74   :  { %v5496_v10 = vld [vmem:[#allocation5 + $0x2d4] ss:$20 sps:$4 sm:$0xff]   ;;  %v5499_v11 = vld [vmem:[#allocation5 + $0x2dc] ss:$20 sps:$4 sm:$0xff]   ;;  %v5497_v13 = vld [vmem:[#allocation5 + $0x2d8] ss:$20 sps:$4 sm:$0xff]  }
  0x75   :  { %1757 = vmatpush1.bf16.msra.mxu0 %v5423_v26  ;;  %1929 = vmatpush1.bf16.msra.mxu1 %v5424_v27  ;;  %v5494_v12 = vld [vmem:[#allocation5 + $0x2d0] ss:$20 sps:$4 sm:$0xff]   ;;  %v5500_v16 = vld [vmem:[#allocation5 + $0x2f8] ss:$20 sps:$4 sm:$0xff]   ;;  %v5503_v17 = vld [vmem:[#allocation5 + $0x300] ss:$20 sps:$4 sm:$0xff]  }
  0x76   :  { %1758 = vmatprep.subr.bf16.mxu0 %v5425_v28  ;;  %1930 = vmatprep.subr.bf16.mxu1 %v5427_v29  ;;  %v5502_v14 = vld [vmem:[#allocation5 + $0x2fc] ss:$20 sps:$4 sm:$0xff]   ;;  %v5505_v15 = vld [vmem:[#allocation5 + $0x304] ss:$20 sps:$4 sm:$0xff]   ;;  %v5511_v19 = vld [vmem:[#allocation5 + $0x32c] ss:$20 sps:$4 sm:$0xff]  }
  0x77   :  { %v5508_v18 = vld [vmem:[#allocation5 + $0x324] ss:$20 sps:$4 sm:$0xff]   ;;  %v5506_v20 = vld [vmem:[#allocation5 + $0x320] ss:$20 sps:$4 sm:$0xff]   ;;  %v5509_v21 = vld [vmem:[#allocation5 + $0x328] ss:$20 sps:$4 sm:$0xff]  }
  0x78   :  { %v5514_v22 = vld [vmem:[#allocation5 + $0x34c] ss:$20 sps:$4 sm:$0xff]   ;;  %v5517_v23 = vld [vmem:[#allocation5 + $0x354] ss:$20 sps:$4 sm:$0xff]   ;;  %v5515_v25 = vld [vmem:[#allocation5 + $0x350] ss:$20 sps:$4 sm:$0xff]  }
  0x79   :  { %1759 = vmatpush1.bf16.msra.mxu0 %v5429_v30  ;;  %1931 = vmatpush1.bf16.msra.mxu1 %v5430_v31  ;;  %v5512_v24 = vld [vmem:[#allocation5 + $0x348] ss:$20 sps:$4 sm:$0xff]   ;;  %v5518_v28 = vld [vmem:[#allocation5 + $0x370] ss:$20 sps:$4 sm:$0xff]   ;;  %v5521_v29 = vld [vmem:[#allocation5 + $0x378] ss:$20 sps:$4 sm:$0xff]  }
  0x7a   :  { %1760 = vmatprep.subr.bf16.mxu0 %v5431_v32  ;;  %1932 = vmatprep.subr.bf16.mxu1 %v5433_v33  ;;  %v5520_v26 = vld [vmem:[#allocation5 + $0x374] ss:$20 sps:$4 sm:$0xff]   ;;  %v5523_v27 = vld [vmem:[#allocation5 + $0x37c] ss:$20 sps:$4 sm:$0xff]   ;;  %v5529_v32 = vld [vmem:[#allocation5 + $0x3a4] ss:$20 sps:$4 sm:$0xff]  }
  0x7b   :  { %v6345_v30 = vld [vmem:[#allocation2 + $0xc] ss:$28 sps:$4 sm:$0xff]   ;;  %v5524_v33 = vld [vmem:[#allocation5 + $0x398] ss:$20 sps:$4 sm:$0xff]   ;;  %vm1740_vm0 = vcmask 130048   ;;  %vm6219_vm1 = vmmov 0  }
  0x7c   :  { %v5526_v31 = vld [vmem:[#allocation5 + $0x39c] ss:$20 sps:$4 sm:$0xff]   ;;  %s6220_s13 = smov [#allocation11]  }
  0x7d   :  { %1761 = vmatpush1.bf16.msra.mxu0 %v5435_v34  ;;  %1933 = vmatpush1.bf16.msra.mxu1 %v5436_v35  ;;  %v5527_v34 = vld [vmem:[#allocation5 + $0x3a0] ss:$20 sps:$4 sm:$0xff]   ;;  %v5532_v35 = vld [vmem:[#allocation5 + $0x3c4] ss:$20 sps:$4 sm:$0xff]   ;;  %v5550_v47 = vld [vmem:[#allocation5 + $0x43c] ss:$20 sps:$4 sm:$0xff]  }
  0x7e   :  { %1762 = vmatprep.subr.bf16.mxu0 %v5437_v36  ;;  %1934 = vmatprep.subr.bf16.mxu1 %v5439_v37  ;;  %v5535_v36 = vld [vmem:[#allocation5 + $0x3cc] ss:$20 sps:$4 sm:$0xff]   ;;  %s4542_s14 = sshll.u32 %s6220_s13, 4  ;;  %s4543_s14 = int_to_ptr.vmem [resolvable:$true] %s4542_s14 }
  0x7f   :  { %v5530_v37 = vld [vmem:[#allocation5 + $0x3c0] ss:$20 sps:$4 sm:$0xff]   ;;  %s6176_s15 = scalar_lea.vmem %s4543_s14, 256  ;;  %p6181_p13 = scmp.lt.s32.totalorder %s4543_s14, %s4543_s14 }
  0x80   :  { %p6177_p12 = scmp.ne.s32.totalorder %s4543_s14, %s6176_s15  ;;  %p6182_p0 = scmp.lt.s32.totalorder %s6176_s15, %s6176_s15 }
  0x81   :  { %1763 = vmatpush1.bf16.msra.mxu0 %v5441_v38  ;;  %1935 = vmatpush1.bf16.msra.mxu1 %v5442_v39  ;;  %v5533_v38 = vld [vmem:[#allocation5 + $0x3c8] ss:$20 sps:$4 sm:$0xff]   ;;  %v5538_v39 = vld [vmem:[#allocation5 + $0x3ec] ss:$20 sps:$4 sm:$0xff]  }
  0x82   :  { %1764 = vmatprep.subr.bf16.mxu0 %v5443_v40  ;;  %1936 = vmatprep.subr.bf16.mxu1 %v5445_v41  ;;  %v5541_v40 = vld [vmem:[#allocation5 + $0x3f4] ss:$20 sps:$4 sm:$0xff]   ;;  %p6183_p1 = por %p6182_p0, %p6181_p13 }
  0x83   :  { %v5536_v41 = vld [vmem:[#allocation5 + $0x3e8] ss:$20 sps:$4 sm:$0xff]  }
  0x84   :  { %p6184_p2 = pnand %p6183_p1, %p6177_p12 }
  0x85   :  { %1765 = vmatpush1.bf16.msra.mxu0 %v5447_v42  ;;  %1937 = vmatpush1.bf16.msra.mxu1 %v5448_v43  ;;  %v5539_v42 = vld [vmem:[#allocation5 + $0x3f0] ss:$20 sps:$4 sm:$0xff]   ;;  %v5544_v43 = vld [vmem:[#allocation5 + $0x414] ss:$20 sps:$4 sm:$0xff]  }
  0x86   :  { %1766 = vmatprep.subr.bf16.mxu0 %v5449_v44  ;;  %1938 = vmatprep.subr.bf16.mxu1 %v5451_v45  ;;  %v5547_v44 = vld [vmem:[#allocation5 + $0x41c] ss:$20 sps:$4 sm:$0xff]  }
  0x87   :  { %v5542_v45 = vld [vmem:[#allocation5 + $0x410] ss:$20 sps:$4 sm:$0xff]  }
  0x89   :  { %1767 = vmatpush1.bf16.msra.mxu0 %v5453_v46  ;;  %1939 = vmatpush1.bf16.msra.mxu1 %v5454_v48  ;;  %v5545_v46 = vld [vmem:[#allocation5 + $0x418] ss:$20 sps:$4 sm:$0xff]  }
  0x8a   :  { %1768 = vmatprep.subr.bf16.mxu0 %v5455_v49  ;;  %1940 = vmatprep.subr.bf16.mxu1 %v5457_v50  ;;  %v5553_v48 = vld [vmem:[#allocation5 + $0x444] ss:$20 sps:$4 sm:$0xff]   ;;  %v5551_v50 = vld [vmem:[#allocation5 + $0x440] ss:$20 sps:$4 sm:$0xff]  }
  0x8b   :  { %v5548_v49 = vld [vmem:[#allocation5 + $0x438] ss:$20 sps:$4 sm:$0xff]  }
  0x8d   :  { %1769 = vmatpush1.bf16.msra.mxu0 %v5459_v51  ;;  %1941 = vmatpush1.bf16.msra.mxu1 %v5460_v52  ;;  %v5556_v51 = vld [vmem:[#allocation5 + $0x464] ss:$20 sps:$4 sm:$0xff]   ;;  %v5559_v52 = vld [vmem:[#allocation5 + $0x46c] ss:$20 sps:$4 sm:$0xff]  }
  0x8e   :  { %1770 = vmatprep.subr.bf16.mxu0 %v5461_v53  ;;  %1942 = vmatprep.subr.bf16.mxu1 %v5463_v54  ;;  %v5554_v53 = vld [vmem:[#allocation5 + $0x460] ss:$20 sps:$4 sm:$0xff]   ;;  %v5557_v54 = vld [vmem:[#allocation5 + $0x468] ss:$20 sps:$4 sm:$0xff]  }
  0x91   :  { %1771 = vmatpush1.bf16.msra.mxu0 %v5465_v55  ;;  %1943 = vmatpush1.bf16.msra.mxu1 %v5466_v56  ;;  %v5562_v55 = vld [vmem:[#allocation5 + $0x48c] ss:$20 sps:$4 sm:$0xff]   ;;  %v5565_v56 = vld [vmem:[#allocation5 + $0x494] ss:$20 sps:$4 sm:$0xff]  }
  0x92   :  { %1772 = vmatprep.subr.bf16.mxu0 %v5467_v57  ;;  %1944 = vmatprep.subr.bf16.mxu1 %v5469_v58  ;;  %v5560_v57 = vld [vmem:[#allocation5 + $0x488] ss:$20 sps:$4 sm:$0xff]   ;;  %v5563_v58 = vld [vmem:[#allocation5 + $0x490] ss:$20 sps:$4 sm:$0xff]  }
  0x95   :  { %1773 = vmatpush1.bf16.msra.mxu0 %v5471_v59  ;;  %1945 = vmatpush1.bf16.msra.mxu1 %v5472_v60  ;;  %v5568_v59 = vld [vmem:[#allocation5 + $0x4b4] ss:$20 sps:$4 sm:$0xff]   ;;  %v5571_v60 = vld [vmem:[#allocation5 + $0x4bc] ss:$20 sps:$4 sm:$0xff]  }
  0x96   :  { %1774 = vmatprep.subr.bf16.mxu0 %v5473_v61  ;;  %1946 = vmatprep.subr.bf16.mxu1 %v5475_v62  ;;  %v5566_v61 = vld [vmem:[#allocation5 + $0x4b0] ss:$20 sps:$4 sm:$0xff]   ;;  %v5569_v62 = vld [vmem:[#allocation5 + $0x4b8] ss:$20 sps:$4 sm:$0xff]  }
  0x99   :  { %1775 = vmatpush1.bf16.msra.mxu0 %v5477_v63  ;;  %1947 = vmatpush1.bf16.msra.mxu1 %v5478_v0  ;;  %v5574_v63 = vld [vmem:[#allocation5 + $0x4dc] ss:$20 sps:$4 sm:$0xff]   ;;  %v5577_v0 = vld [vmem:[#allocation5 + $0x4e4] ss:$20 sps:$4 sm:$0xff]  }
  0x9a   :  { %1787 = vmatprep.subr.bf16.mxu0 %v5483_v1  ;;  %1959 = vmatprep.subr.bf16.mxu1 %v5486_v2  ;;  %v5572_v1 = vld [vmem:[#allocation5 + $0x4d8] ss:$20 sps:$4 sm:$0xff]   ;;  %v5575_v2 = vld [vmem:[#allocation5 + $0x4e0] ss:$20 sps:$4 sm:$0xff]  }
  0x9c   :  { %1777 = vmatmul.mubr.bf16.vlgmr.msra.gmra.mrb[0].mxu0 %v5487_v5  ;;  %1949 = vmatmul.mubr.bf16.vlgmr.msra.gmra.mrb[0].mxu1 %v5487_v5  ;;  %v6349_v5 = vld [vmem:[#allocation2 + $0x8] ss:$28 sps:$4 sm:$0xff]  }
  0x9d   :  { %1788 = vmatpush1.bf16.msra.mxu0 %v5481_v3  ;;  %1960 = vmatpush1.bf16.msra.mxu1 %v5484_v4  ;;  %v5583_v3 = vld [vmem:[#allocation5 + $0x504] ss:$20 sps:$4 sm:$0xff]   ;;  %v5586_v4 = vld [vmem:[#allocation5 + $0x50c] ss:$20 sps:$4 sm:$0xff]  }
  0x9e   :  { %1789 = vmatprep.subr.bf16.mxu0 %v5490_v6  ;;  %1961 = vmatprep.subr.bf16.mxu1 %v5493_v7  ;;  %v5581_v6 = vld [vmem:[#allocation5 + $0x500] ss:$20 sps:$4 sm:$0xff]   ;;  %v5584_v7 = vld [vmem:[#allocation5 + $0x508] ss:$20 sps:$4 sm:$0xff]  }
  0x9f   :  { %1819 = vmatprep.mubr.bf16.mxu0 %v6345_v30  ;;  %1991 = vmatprep.mubr.bf16.mxu1 %v6345_v30 }
  0xa1   :  { %1790 = vmatpush1.bf16.msra.mxu0 %v5488_v8  ;;  %1962 = vmatpush1.bf16.msra.mxu1 %v5491_v9  ;;  %v5589_v8 = vld [vmem:[#allocation5 + $0x52c] ss:$20 sps:$4 sm:$0xff]   ;;  %v5592_v9 = vld [vmem:[#allocation5 + $0x534] ss:$20 sps:$4 sm:$0xff]  }
  0xa2   :  { %1791 = vmatprep.subr.bf16.mxu0 %v5496_v10  ;;  %1963 = vmatprep.subr.bf16.mxu1 %v5499_v11  ;;  %v5587_v10 = vld [vmem:[#allocation5 + $0x528] ss:$20 sps:$4 sm:$0xff]   ;;  %v5590_v11 = vld [vmem:[#allocation5 + $0x530] ss:$20 sps:$4 sm:$0xff]  }
  0xa5   :  { %1792 = vmatpush1.bf16.msra.mxu0 %v5494_v12  ;;  %1964 = vmatpush1.bf16.msra.mxu1 %v5497_v13  ;;  %v6353_v12 = vld [vmem:[#allocation2 + $0x14] ss:$28 sps:$4 sm:$0xff]   ;;  %v5595_v13 = vld [vmem:[#allocation5 + $0x554] ss:$20 sps:$4 sm:$0xff]  }
  0xa6   :  { %1793 = vmatprep.subr.bf16.mxu0 %v5502_v14  ;;  %1965 = vmatprep.subr.bf16.mxu1 %v5505_v15  ;;  %v5598_v14 = vld [vmem:[#allocation5 + $0x55c] ss:$20 sps:$4 sm:$0xff]  }
  0xa7   :  { %v5593_v15 = vld [vmem:[#allocation5 + $0x550] ss:$20 sps:$4 sm:$0xff]  }
  0xa9   :  { %1794 = vmatpush1.bf16.msra.mxu0 %v5500_v16  ;;  %1966 = vmatpush1.bf16.msra.mxu1 %v5503_v17  ;;  %v5596_v16 = vld [vmem:[#allocation5 + $0x558] ss:$20 sps:$4 sm:$0xff]   ;;  %v5601_v17 = vld [vmem:[#allocation5 + $0x57c] ss:$20 sps:$4 sm:$0xff]  }
  0xaa   :  { %1795 = vmatprep.subr.bf16.mxu0 %v5508_v18  ;;  %1967 = vmatprep.subr.bf16.mxu1 %v5511_v19  ;;  %v5604_v18 = vld [vmem:[#allocation5 + $0x584] ss:$20 sps:$4 sm:$0xff]  }
  0xab   :  { %v5599_v19 = vld [vmem:[#allocation5 + $0x578] ss:$20 sps:$4 sm:$0xff]  }
  0xad   :  { %1796 = vmatpush1.bf16.msra.mxu0 %v5506_v20  ;;  %1968 = vmatpush1.bf16.msra.mxu1 %v5509_v21  ;;  %v5602_v20 = vld [vmem:[#allocation5 + $0x580] ss:$20 sps:$4 sm:$0xff]   ;;  %v5607_v21 = vld [vmem:[#allocation5 + $0x5a4] ss:$20 sps:$4 sm:$0xff]  }
  0xae   :  { %1797 = vmatprep.subr.bf16.mxu0 %v5514_v22  ;;  %1969 = vmatprep.subr.bf16.mxu1 %v5517_v23  ;;  %v5610_v22 = vld [vmem:[#allocation5 + $0x5ac] ss:$20 sps:$4 sm:$0xff]  }
  0xaf   :  { %v5605_v23 = vld [vmem:[#allocation5 + $0x5a0] ss:$20 sps:$4 sm:$0xff]  }
  0xb1   :  { %1798 = vmatpush1.bf16.msra.mxu0 %v5512_v24  ;;  %1970 = vmatpush1.bf16.msra.mxu1 %v5515_v25  ;;  %v5608_v24 = vld [vmem:[#allocation5 + $0x5a8] ss:$20 sps:$4 sm:$0xff]   ;;  %v5613_v25 = vld [vmem:[#allocation5 + $0x5cc] ss:$20 sps:$4 sm:$0xff]  }
  0xb2   :  { %1799 = vmatprep.subr.bf16.mxu0 %v5520_v26  ;;  %1971 = vmatprep.subr.bf16.mxu1 %v5523_v27  ;;  %v5616_v26 = vld [vmem:[#allocation5 + $0x5d4] ss:$20 sps:$4 sm:$0xff]  }
  0xb3   :  { %v5611_v27 = vld [vmem:[#allocation5 + $0x5c8] ss:$20 sps:$4 sm:$0xff]  }
  0xb5   :  { %1800 = vmatpush1.bf16.msra.mxu0 %v5518_v28  ;;  %1972 = vmatpush1.bf16.msra.mxu1 %v5521_v29  ;;  %v5614_v28 = vld [vmem:[#allocation5 + $0x5d0] ss:$20 sps:$4 sm:$0xff]   ;;  %v5619_v29 = vld [vmem:[#allocation5 + $0x5f4] ss:$20 sps:$4 sm:$0xff]  }
  0xb6   :  { %1801 = vmatprep.subr.bf16.mxu0 %v5526_v31  ;;  %1973 = vmatprep.subr.bf16.mxu1 %v5529_v32  ;;  %v5622_v31 = vld [vmem:[#allocation5 + $0x5fc] ss:$20 sps:$4 sm:$0xff]  }
  0xb7   :  { %v5617_v32 = vld [vmem:[#allocation5 + $0x5f0] ss:$20 sps:$4 sm:$0xff]  }
  0xb9   :  { %1802 = vmatpush1.bf16.msra.mxu0 %v5524_v33  ;;  %1974 = vmatpush1.bf16.msra.mxu1 %v5527_v34  ;;  %v5620_v33 = vld [vmem:[#allocation5 + $0x5f8] ss:$20 sps:$4 sm:$0xff]   ;;  %v5625_v34 = vld [vmem:[#allocation5 + $0x61c] ss:$20 sps:$4 sm:$0xff]  }
  0xba   :  { %1803 = vmatprep.subr.bf16.mxu0 %v5532_v35  ;;  %1975 = vmatprep.subr.bf16.mxu1 %v5535_v36  ;;  %v5628_v35 = vld [vmem:[#allocation5 + $0x624] ss:$20 sps:$4 sm:$0xff]  }
  0xbb   :  { %v5623_v36 = vld [vmem:[#allocation5 + $0x618] ss:$20 sps:$4 sm:$0xff]  }
  0xbd   :  { %1804 = vmatpush1.bf16.msra.mxu0 %v5530_v37  ;;  %1976 = vmatpush1.bf16.msra.mxu1 %v5533_v38  ;;  %v5626_v37 = vld [vmem:[#allocation5 + $0x620] ss:$20 sps:$4 sm:$0xff]   ;;  %v5631_v38 = vld [vmem:[#allocation5 + $0x644] ss:$20 sps:$4 sm:$0xff]  }
  0xbe   :  { %1805 = vmatprep.subr.bf16.mxu0 %v5538_v39  ;;  %1977 = vmatprep.subr.bf16.mxu1 %v5541_v40  ;;  %v5634_v39 = vld [vmem:[#allocation5 + $0x64c] ss:$20 sps:$4 sm:$0xff]  }
  0xbf   :  { %v5629_v40 = vld [vmem:[#allocation5 + $0x640] ss:$20 sps:$4 sm:$0xff]  }
  0xc1   :  { %1806 = vmatpush1.bf16.msra.mxu0 %v5536_v41  ;;  %1978 = vmatpush1.bf16.msra.mxu1 %v5539_v42  ;;  %v5632_v41 = vld [vmem:[#allocation5 + $0x648] ss:$20 sps:$4 sm:$0xff]   ;;  %v5637_v42 = vld [vmem:[#allocation5 + $0x66c] ss:$20 sps:$4 sm:$0xff]  }
  0xc2   :  { %1807 = vmatprep.subr.bf16.mxu0 %v5544_v43  ;;  %1979 = vmatprep.subr.bf16.mxu1 %v5547_v44  ;;  %v5640_v43 = vld [vmem:[#allocation5 + $0x674] ss:$20 sps:$4 sm:$0xff]  }
  0xc3   :  { %v5635_v44 = vld [vmem:[#allocation5 + $0x668] ss:$20 sps:$4 sm:$0xff]  }
  0xc5   :  { %1808 = vmatpush1.bf16.msra.mxu0 %v5542_v45  ;;  %1980 = vmatpush1.bf16.msra.mxu1 %v5545_v46  ;;  %v5638_v45 = vld [vmem:[#allocation5 + $0x670] ss:$20 sps:$4 sm:$0xff]   ;;  %v5643_v46 = vld [vmem:[#allocation5 + $0x694] ss:$20 sps:$4 sm:$0xff]  }
  0xc6   :  { %1809 = vmatprep.subr.bf16.mxu0 %v5550_v47  ;;  %1981 = vmatprep.subr.bf16.mxu1 %v5553_v48  ;;  %v5646_v47 = vld [vmem:[#allocation5 + $0x69c] ss:$20 sps:$4 sm:$0xff]  }
  0xc7   :  { %v5641_v48 = vld [vmem:[#allocation5 + $0x690] ss:$20 sps:$4 sm:$0xff]  }
  0xc9   :  { %1810 = vmatpush1.bf16.msra.mxu0 %v5548_v49  ;;  %1982 = vmatpush1.bf16.msra.mxu1 %v5551_v50  ;;  %v5644_v49 = vld [vmem:[#allocation5 + $0x698] ss:$20 sps:$4 sm:$0xff]   ;;  %v5649_v50 = vld [vmem:[#allocation5 + $0x6bc] ss:$20 sps:$4 sm:$0xff]  }
  0xca   :  { %1811 = vmatprep.subr.bf16.mxu0 %v5556_v51  ;;  %1983 = vmatprep.subr.bf16.mxu1 %v5559_v52  ;;  %v5652_v51 = vld [vmem:[#allocation5 + $0x6c4] ss:$20 sps:$4 sm:$0xff]  }
  0xcb   :  { %v5647_v52 = vld [vmem:[#allocation5 + $0x6b8] ss:$20 sps:$4 sm:$0xff]  }
  0xcd   :  { %1812 = vmatpush1.bf16.msra.mxu0 %v5554_v53  ;;  %1984 = vmatpush1.bf16.msra.mxu1 %v5557_v54  ;;  %v5650_v53 = vld [vmem:[#allocation5 + $0x6c0] ss:$20 sps:$4 sm:$0xff]   ;;  %v5655_v54 = vld [vmem:[#allocation5 + $0x6e4] ss:$20 sps:$4 sm:$0xff]  }
  0xce   :  { %1813 = vmatprep.subr.bf16.mxu0 %v5562_v55  ;;  %1985 = vmatprep.subr.bf16.mxu1 %v5565_v56  ;;  %v5658_v55 = vld [vmem:[#allocation5 + $0x6ec] ss:$20 sps:$4 sm:$0xff]  }
  0xcf   :  { %v5653_v56 = vld [vmem:[#allocation5 + $0x6e0] ss:$20 sps:$4 sm:$0xff]  }
  0xd1   :  { %1814 = vmatpush1.bf16.msra.mxu0 %v5560_v57  ;;  %1986 = vmatpush1.bf16.msra.mxu1 %v5563_v58  ;;  %v5656_v57 = vld [vmem:[#allocation5 + $0x6e8] ss:$20 sps:$4 sm:$0xff]   ;;  %v5661_v58 = vld [vmem:[#allocation5 + $0x70c] ss:$20 sps:$4 sm:$0xff]  }
  0xd2   :  { %1815 = vmatprep.subr.bf16.mxu0 %v5568_v59  ;;  %1987 = vmatprep.subr.bf16.mxu1 %v5571_v60  ;;  %v5664_v59 = vld [vmem:[#allocation5 + $0x714] ss:$20 sps:$4 sm:$0xff]  }
  0xd3   :  { %v5659_v60 = vld [vmem:[#allocation5 + $0x708] ss:$20 sps:$4 sm:$0xff]  }
  0xd5   :  { %1816 = vmatpush1.bf16.msra.mxu0 %v5566_v61  ;;  %1988 = vmatpush1.bf16.msra.mxu1 %v5569_v62  ;;  %v5662_v61 = vld [vmem:[#allocation5 + $0x710] ss:$20 sps:$4 sm:$0xff]   ;;  %v5667_v62 = vld [vmem:[#allocation5 + $0x734] ss:$20 sps:$4 sm:$0xff]  }
  0xd6   :  { %1817 = vmatprep.subr.bf16.mxu0 %v5574_v63  ;;  %1989 = vmatprep.subr.bf16.mxu1 %v5577_v0  ;;  %v5670_v63 = vld [vmem:[#allocation5 + $0x73c] ss:$20 sps:$4 sm:$0xff]  }
  0xd7   :  { %v5665_v0 = vld [vmem:[#allocation5 + $0x730] ss:$20 sps:$4 sm:$0xff]  }
  0xd9   :  { %1818 = vmatpush1.bf16.msra.mxu0 %v5572_v1  ;;  %1990 = vmatpush1.bf16.msra.mxu1 %v5575_v2  ;;  %v5668_v1 = vld [vmem:[#allocation5 + $0x738] ss:$20 sps:$4 sm:$0xff]   ;;  %v5673_v2 = vld [vmem:[#allocation5 + $0x75c] ss:$20 sps:$4 sm:$0xff]  }
  0xda   :  { %1830 = vmatprep.subr.bf16.mxu0 %v5583_v3  ;;  %2002 = vmatprep.subr.bf16.mxu1 %v5586_v4  ;;  %v5676_v3 = vld [vmem:[#allocation5 + $0x764] ss:$20 sps:$4 sm:$0xff]  }
  0xdb   :  { %v5671_v4 = vld [vmem:[#allocation5 + $0x758] ss:$20 sps:$4 sm:$0xff]  }
  0xdc   :  { %1820 = vmatmul.mubr.bf16.vlgmr.msra.gmra.mrb[0].mxu0 %v6349_v5  ;;  %1992 = vmatmul.mubr.bf16.vlgmr.msra.gmra.mrb[0].mxu1 %v6349_v5 }
  0xdd   :  { %1831 = vmatpush1.bf16.msra.mxu0 %v5581_v6  ;;  %2003 = vmatpush1.bf16.msra.mxu1 %v5584_v7  ;;  %v5674_v6 = vld [vmem:[#allocation5 + $0x760] ss:$20 sps:$4 sm:$0xff]   ;;  %v5682_v7 = vld [vmem:[#allocation5 + $0x784] ss:$20 sps:$4 sm:$0xff]  }
  0xde   :  { %1832 = vmatprep.subr.bf16.mxu0 %v5589_v8  ;;  %2004 = vmatprep.subr.bf16.mxu1 %v5592_v9  ;;  %v5685_v8 = vld [vmem:[#allocation5 + $0x78c] ss:$20 sps:$4 sm:$0xff]   ;;  %v6357_v9 = vld [vmem:[#allocation2 + $0x10] ss:$28 sps:$4 sm:$0xff]  }
  0xdf   :  { %1862 = vmatprep.mubr.bf16.mxu0 %v6353_v12  ;;  %2034 = vmatprep.mubr.bf16.mxu1 %v6353_v12 }
  0xe1   :  { %1833 = vmatpush1.bf16.msra.mxu0 %v5587_v10  ;;  %2005 = vmatpush1.bf16.msra.mxu1 %v5590_v11  ;;  %v5680_v10 = vld [vmem:[#allocation5 + $0x780] ss:$20 sps:$4 sm:$0xff]   ;;  %v5683_v11 = vld [vmem:[#allocation5 + $0x788] ss:$20 sps:$4 sm:$0xff]  }
  0xe2   :  { %1834 = vmatprep.subr.bf16.mxu0 %v5595_v13  ;;  %2006 = vmatprep.subr.bf16.mxu1 %v5598_v14  ;;  %v5687_v13 = vld [vmem:[#allocation5 + $0x150] ss:$20 sps:$4 sm:$0xff]  }
  0xe3   :  { %v5703_v14 = vld [vmem:[#allocation5 + $0x3d0] ss:$20 sps:$4 sm:$0xff]  }
  0xe5   :  { %1835 = vmatpush1.bf16.msra.mxu0 %v5593_v15  ;;  %2007 = vmatpush1.bf16.msra.mxu1 %v5596_v16  ;;  %v6217_v15 = vmov 0   ;;  %v6363_v16 = vld [vmem:[#allocation2 + $0x18] ss:$28 sps:$4 sm:$0xff]  }
  0xe6   :  { %1836 = vmatprep.subr.bf16.mxu0 %v5601_v17  ;;  %2008 = vmatprep.subr.bf16.mxu1 %v5604_v18  ;;  %v5688_v17 = vld [vmem:[#allocation5 + $0x10] ss:$20 sps:$4 sm:$0xff]  }
  0xe7   :  { %v5704_v18 = vld [vmem:[#allocation5 + $0x290] ss:$20 sps:$4 sm:$0xff]  }
  0xe9   :  { %1837 = vmatpush1.bf16.msra.mxu0 %v5599_v19  ;;  %2009 = vmatpush1.bf16.msra.mxu1 %v5602_v20  ;;  %v5689_v19 = vld [vmem:[#allocation5 + $0x178] ss:$20 sps:$4 sm:$0xff]  }
  0xea   :  { %1838 = vmatprep.subr.bf16.mxu0 %v5607_v21  ;;  %2010 = vmatprep.subr.bf16.mxu1 %v5610_v22  ;;  %v5706_v20 = vld [vmem:[#allocation5 + $0x3f8] ss:$20 sps:$4 sm:$0xff]   ;;  %v5691_v22 = vld [vmem:[#allocation5 + $0x1a0] ss:$20 sps:$4 sm:$0xff]  }
  0xeb   :  { %v5690_v21 = vld [vmem:[#allocation5 + $0x38] ss:$20 sps:$4 sm:$0xff]  }
  0xed   :  { %1839 = vmatpush1.bf16.msra.mxu0 %v5605_v23  ;;  %2011 = vmatpush1.bf16.msra.mxu1 %v5608_v24  ;;  %v5708_v23 = vld [vmem:[#allocation5 + $0x2b8] ss:$20 sps:$4 sm:$0xff]  }
  0xee   :  { %1840 = vmatprep.subr.bf16.mxu0 %v5613_v25  ;;  %2012 = vmatprep.subr.bf16.mxu1 %v5616_v26  ;;  %v6064_v24 = vld [vmem:[#allocation2 + $0x4] ss:$28 sps:$4 sm:$0xff]   ;;  %v5710_v25 = vld [vmem:[#allocation5 + $0x420] ss:$20 sps:$4 sm:$0xff]  }
  0xef   :  { %v5692_v26 = vld [vmem:[#allocation5 + $0x60] ss:$20 sps:$4 sm:$0xff]  }
  0xf1   :  { %1841 = vmatpush1.bf16.msra.mxu0 %v5611_v27  ;;  %2013 = vmatpush1.bf16.msra.mxu1 %v5614_v28  ;;  %v5693_v27 = vld [vmem:[#allocation5 + $0x1c8] ss:$20 sps:$4 sm:$0xff]   ;;  %v5712_v28 = vld [vmem:[#allocation5 + $0x2e0] ss:$20 sps:$4 sm:$0xff]  }
  0xf2   :  { %1842 = vmatprep.subr.bf16.mxu0 %v5619_v29  ;;  %2014 = vmatprep.subr.bf16.mxu1 %v5622_v31  ;;  %v5714_v29 = vld [vmem:[#allocation5 + $0x448] ss:$20 sps:$4 sm:$0xff]  }
  0xf3   :  { %v5694_v31 = vld [vmem:[#allocation5 + $0x88] ss:$20 sps:$4 sm:$0xff]  }
  0xf5   :  { %1843 = vmatpush1.bf16.msra.mxu0 %v5617_v32  ;;  %2015 = vmatpush1.bf16.msra.mxu1 %v5620_v33  ;;  %v5695_v32 = vld [vmem:[#allocation5 + $0x1f0] ss:$20 sps:$4 sm:$0xff]   ;;  %v5716_v33 = vld [vmem:[#allocation5 + $0x308] ss:$20 sps:$4 sm:$0xff]  }
  0xf6   :  { %1844 = vmatprep.subr.bf16.mxu0 %v5625_v34  ;;  %2016 = vmatprep.subr.bf16.mxu1 %v5628_v35  ;;  %v5718_v34 = vld [vmem:[#allocation5 + $0x470] ss:$20 sps:$4 sm:$0xff]  }
  0xf7   :  { %v5696_v35 = vld [vmem:[#allocation5 + $0xb0] ss:$20 sps:$4 sm:$0xff]  }
  0xf9   :  { %1845 = vmatpush1.bf16.msra.mxu0 %v5623_v36  ;;  %2017 = vmatpush1.bf16.msra.mxu1 %v5626_v37  ;;  %v5697_v36 = vld [vmem:[#allocation5 + $0x218] ss:$20 sps:$4 sm:$0xff]  }
  0xfa   :  { %1846 = vmatprep.subr.bf16.mxu0 %v5631_v38  ;;  %2018 = vmatprep.subr.bf16.mxu1 %v5634_v39  ;;  %v5722_v37 = vld [vmem:[#allocation5 + $0x498] ss:$20 sps:$4 sm:$0xff]  }
  0xfb   :  { %v5698_v38 = vld [vmem:[#allocation5 + $0xd8] ss:$20 sps:$4 sm:$0xff]  }
  0xfc   :  { %v5724_v39 = vld [vmem:[#allocation5 + $0x358] ss:$20 sps:$4 sm:$0xff]  }
  0xfd   :  { %1847 = vmatpush1.bf16.msra.mxu0 %v5629_v40  ;;  %2019 = vmatpush1.bf16.msra.mxu1 %v5632_v41  ;;  %v5699_v40 = vld [vmem:[#allocation5 + $0x240] ss:$20 sps:$4 sm:$0xff]  }
  0xfe   :  { %1848 = vmatprep.subr.bf16.mxu0 %v5637_v42  ;;  %2020 = vmatprep.subr.bf16.mxu1 %v5640_v43  ;;  %v5726_v41 = vld [vmem:[#allocation5 + $0x4c0] ss:$20 sps:$4 sm:$0xff]  }
  0xff   :  { %v5700_v42 = vld [vmem:[#allocation5 + $0x100] ss:$20 sps:$4 sm:$0xff]  }
 0x100   :  { %v5728_v43 = vld [vmem:[#allocation5 + $0x380] ss:$20 sps:$4 sm:$0xff]  }
 0x101   :  { %1849 = vmatpush1.bf16.msra.mxu0 %v5635_v44  ;;  %2021 = vmatpush1.bf16.msra.mxu1 %v5638_v45  ;;  %v5701_v44 = vld [vmem:[#allocation5 + $0x268] ss:$20 sps:$4 sm:$0xff]  }
 0x102   :  { %1850 = vmatprep.subr.bf16.mxu0 %v5643_v46  ;;  %2022 = vmatprep.subr.bf16.mxu1 %v5646_v47  ;;  %v5730_v45 = vld [vmem:[#allocation5 + $0x4e8] ss:$20 sps:$4 sm:$0xff]  }
 0x103   :  { %v5702_v46 = vld [vmem:[#allocation5 + $0x128] ss:$20 sps:$4 sm:$0xff]  }
 0x104   :  { %v5732_v47 = vld [vmem:[#allocation5 + $0x3a8] ss:$20 sps:$4 sm:$0xff]  }
 0x105   :  { %1851 = vmatpush1.bf16.msra.mxu0 %v5641_v48  ;;  %2023 = vmatpush1.bf16.msra.mxu1 %v5644_v49  ;;  %v5705_v48 = vld [vmem:[#allocation5 + $0x650] ss:$20 sps:$4 sm:$0xff]  }
 0x106   :  { %1852 = vmatprep.subr.bf16.mxu0 %v5649_v50  ;;  %2024 = vmatprep.subr.bf16.mxu1 %v5652_v51  ;;  %v5707_v49 = vld [vmem:[#allocation5 + $0x510] ss:$20 sps:$4 sm:$0xff]   ;;  %v5709_v50 = vld [vmem:[#allocation5 + $0x678] ss:$20 sps:$4 sm:$0xff]  }
 0x107   :  { %v5735_v51 = vld [vmem:[#allocation5 + $0x790] ss:$20 sps:$4 sm:$0xff]  }
 0x109   :  { %1853 = vmatpush1.bf16.msra.mxu0 %v5647_v52  ;;  %2025 = vmatpush1.bf16.msra.mxu1 %v5650_v53  ;;  %v5738_v52 = vld [vmem:[#allocation7 + $0x4] ss:$20 sps:$4 sm:$0xff]   ;;  %v6218_v53 = vmov 0.0  }
 0x10a   :  { %1854 = vmatprep.subr.bf16.mxu0 %v5655_v54  ;;  %2026 = vmatprep.subr.bf16.mxu1 %v5658_v55  ;;  %v5711_v54 = vld [vmem:[#allocation5 + $0x538] ss:$20 sps:$4 sm:$0xff]   ;;  %v6065_v55 = vld [vmem:[#allocation2] ss:$28 sps:$4 sm:$0xff]  }
 0x10d   :  { %1855 = vmatpush1.bf16.msra.mxu0 %v5653_v56  ;;  %2027 = vmatpush1.bf16.msra.mxu1 %v5656_v57  ;;  %v5713_v56 = vld [vmem:[#allocation5 + $0x6a0] ss:$20 sps:$4 sm:$0xff]  }
 0x10e   :  { %1856 = vmatprep.subr.bf16.mxu0 %v5661_v58  ;;  %2028 = vmatprep.subr.bf16.mxu1 %v5664_v59  ;;  %v5715_v57 = vld [vmem:[#allocation5 + $0x560] ss:$20 sps:$4 sm:$0xff]   ;;  %v5736_v58 = vld [vmem:[#allocation7] ss:$20 sps:$4 sm:$0xff]  }
 0x10f   :  { %v5717_v59 = vld [vmem:[#allocation5 + $0x6c8] ss:$20 sps:$4 sm:$0xff]  }
 0x111   :  { %1857 = vmatpush1.bf16.msra.mxu0 %v5659_v60  ;;  %2029 = vmatpush1.bf16.msra.mxu1 %v5662_v61  ;;  %v5744_v60 = vld [vmem:[#allocation7 + $0x2c] ss:$20 sps:$4 sm:$0xff]  }
 0x112   :  { %1858 = vmatprep.subr.bf16.mxu0 %v5667_v62  ;;  %2030 = vmatprep.subr.bf16.mxu1 %v5670_v63  ;;  %v5719_v61 = vld [vmem:[#allocation5 + $0x588] ss:$20 sps:$4 sm:$0xff]   ;;  %v5742_v62 = vld [vmem:[#allocation7 + $0x28] ss:$20 sps:$4 sm:$0xff]  }
 0x113   :  { %v5721_v63 = vld [vmem:[#allocation5 + $0x6f0] ss:$20 sps:$4 sm:$0xff]  }
 0x115   :  { %1859 = vmatpush1.bf16.msra.mxu0 %v5665_v0  ;;  %2031 = vmatpush1.bf16.msra.mxu1 %v5668_v1  ;;  %v5748_v0 = vld [vmem:[#allocation7 + $0x50] ss:$20 sps:$4 sm:$0xff]  }
 0x116   :  { %1860 = vmatprep.subr.bf16.mxu0 %v5673_v2  ;;  %2032 = vmatprep.subr.bf16.mxu1 %v5676_v3  ;;  %v5725_v1 = vld [vmem:[#allocation5 + $0x718] ss:$20 sps:$4 sm:$0xff]  }
 0x117   :  { %v5756_v2 = vld [vmem:[#allocation7 + $0x7c] ss:$20 sps:$4 sm:$0xff]  }
 0x118   :  { %v5727_v3 = vld [vmem:[#allocation5 + $0x5d8] ss:$20 sps:$4 sm:$0xff]  }
 0x119   :  { %1861 = vmatpush1.bf16.msra.mxu0 %v5671_v4  ;;  %2033 = vmatpush1.bf16.msra.mxu1 %v5674_v6  ;;  %v5754_v4 = vld [vmem:[#allocation7 + $0x78] ss:$20 sps:$4 sm:$0xff]  }
 0x11a   :  { %1873 = vmatprep.subr.bf16.mxu0 %v5682_v7  ;;  %2045 = vmatprep.subr.bf16.mxu1 %v5685_v8  ;;  %v5729_v6 = vld [vmem:[#allocation5 + $0x740] ss:$20 sps:$4 sm:$0xff]  }
 0x11b   :  { %v5762_v7 = vld [vmem:[#allocation7 + $0xa4] ss:$20 sps:$4 sm:$0xff]  }
 0x11c   :  { %1863 = vmatmul.mubr.bf16.vlgmr.msra.gmra.mrb[0].mxu0 %v6357_v9  ;;  %2035 = vmatmul.mubr.bf16.vlgmr.msra.gmra.mrb[0].mxu1 %v6357_v9  ;;  %v5731_v8 = vld [vmem:[#allocation5 + $0x600] ss:$20 sps:$4 sm:$0xff]  }
 0x11d   :  { %1874 = vmatpush1.bf16.msra.mxu0 %v5680_v10  ;;  %2046 = vmatpush1.bf16.msra.mxu1 %v5683_v11  ;;  %v5760_v10 = vld [vmem:[#allocation7 + $0xa0] ss:$20 sps:$4 sm:$0xff]  }
 0x11e   :  { %1905 = vmatprep.mubr.bf16.mxu0 %v6217_v15  ;;  %2077 = vmatprep.mubr.bf16.mxu1 %v6217_v15  ;;  %v5733_v11 = vld [vmem:[#allocation5 + $0x768] ss:$20 sps:$4 sm:$0xff]  }
 0x11f   :  { %5061 = vmatprep.subr.bf16.mxu0 %v5687_v13  ;;  %5083 = vmatprep.subr.bf16.mxu1 %v5703_v14  ;;  %v5768_v13 = vld [vmem:[#allocation7 + $0xcc] ss:$20 sps:$4 sm:$0xff]  }
 0x120   :  { %v5734_v14 = vld [vmem:[#allocation5 + $0x628] ss:$20 sps:$4 sm:$0xff]  }
 0x128   :  { %4808 = vmatmul.mubr.msk.bf16.vlgmr.msra.gmra.mrb[0].mxu0 %vm1740_vm0, %v6363_v16  ;;  %4809 = vmatmul.mubr.msk.bf16.vlgmr.msra.gmra.mrb[0].mxu1 %vm1740_vm0, %v6363_v16 }
 0x129   :  { %5062 = vmatpush3.bf16.msra.mxu0 %v5688_v17  ;;  %5084 = vmatpush3.bf16.msra.mxu1 %v5704_v18  ;;  %v5741_v17 = vld [vmem:[#allocation7 + $0xc] ss:$20 sps:$4 sm:$0xff]   ;;  %v5774_v18 = vld [vmem:[#allocation7 + $0xf4] ss:$20 sps:$4 sm:$0xff]  }
 0x12a   :  { %5063 = vmatprep.subr.bf16.mxu0 %v5689_v19  ;;  %2120 = vmatprep.mubr.bf16.mxu0 %v6064_v24  ;;  %v5739_v19 = vld [vmem:[#allocation7 + $0x8] ss:$20 sps:$4 sm:$0xff]   ;;  %v5778_v24 = vld [vmem:[#allocation7 + $0x118] ss:$20 sps:$4 sm:$0xff]  }
 0x12b   :  { %5085 = vmatprep.subr.bf16.mxu1 %v5706_v20  ;;  %2161 = vmatprep.mubr.bf16.mxu1 %v6345_v30  ;;  %v5720_v30 = vld [vmem:[#allocation5 + $0x330] ss:$20 sps:$4 sm:$0xff]   ;;  %v5772_v20 = vld [vmem:[#allocation7 + $0xf0] ss:$20 sps:$4 sm:$0xff]  }
 0x12d   :  { %5064 = vmatpush3.bf16.msra.mxu0 %v5690_v21  ;;  %5086 = vmatpush3.bf16.msra.mxu1 %v5708_v23  ;;  %v5747_v21 = vld [vmem:[#allocation7 + $0x34] ss:$20 sps:$4 sm:$0xff]   ;;  %v5745_v23 = vld [vmem:[#allocation7 + $0x30] ss:$20 sps:$4 sm:$0xff]  }
 0x12e   :  { %5065 = vmatprep.subr.bf16.mxu0 %v5691_v22  ;;  %5087 = vmatprep.subr.bf16.mxu1 %v5710_v25  ;;  %v5780_v22 = vld [vmem:[#allocation7 + $0x11c] ss:$20 sps:$4 sm:$0xff]  }
 0x12f   :  { %v5753_v25 = vld [vmem:[#allocation7 + $0x5c] ss:$20 sps:$4 sm:$0xff]  }
 0x131   :  { %5066 = vmatpush3.bf16.msra.mxu0 %v5692_v26  ;;  %5088 = vmatpush3.bf16.msra.mxu1 %v5712_v28  ;;  %v5786_v26 = vld [vmem:[#allocation7 + $0x144] ss:$20 sps:$4 sm:$0xff]   ;;  %v5784_v28 = vld [vmem:[#allocation7 + $0x140] ss:$20 sps:$4 sm:$0xff]  }
 0x132   :  { %5067 = vmatprep.subr.bf16.mxu0 %v5693_v27  ;;  %5089 = vmatprep.subr.bf16.mxu1 %v5714_v29  ;;  %v5751_v27 = vld [vmem:[#allocation7 + $0x58] ss:$20 sps:$4 sm:$0xff]  }
 0x133   :  { %v5759_v29 = vld [vmem:[#allocation7 + $0x84] ss:$20 sps:$4 sm:$0xff]  }
 0x135   :  { %5068 = vmatpush3.bf16.msra.mxu0 %v5694_v31  ;;  %5090 = vmatpush3.bf16.msra.mxu1 %v5716_v33  ;;  %v5792_v31 = vld [vmem:[#allocation7 + $0x16c] ss:$20 sps:$4 sm:$0xff]   ;;  %v5790_v33 = vld [vmem:[#allocation7 + $0x168] ss:$20 sps:$4 sm:$0xff]  }
 0x136   :  { %5069 = vmatprep.subr.bf16.mxu0 %v5695_v32  ;;  %5091 = vmatprep.subr.bf16.mxu1 %v5718_v34  ;;  %v5757_v32 = vld [vmem:[#allocation7 + $0x80] ss:$20 sps:$4 sm:$0xff]  }
 0x137   :  { %v5765_v34 = vld [vmem:[#allocation7 + $0xac] ss:$20 sps:$4 sm:$0xff]  }
 0x139   :  { %5070 = vmatpush3.bf16.msra.mxu0 %v5696_v35  ;;  %5092 = vmatpush3.bf16.msra.mxu1 %v5720_v30  ;;  %v5798_v35 = vld [vmem:[#allocation7 + $0x194] ss:$20 sps:$4 sm:$0xff]  }
 0x13a   :  { %5071 = vmatprep.subr.bf16.mxu0 %v5697_v36  ;;  %5093 = vmatprep.subr.bf16.mxu1 %v5722_v37  ;;  %v5796_v36 = vld [vmem:[#allocation7 + $0x190] ss:$20 sps:$4 sm:$0xff]   ;;  %v5771_v30 = vld [vmem:[#allocation7 + $0xd4] ss:$20 sps:$4 sm:$0xff]  }
 0x13b   :  { %v5804_v37 = vld [vmem:[#allocation7 + $0x1bc] ss:$20 sps:$4 sm:$0xff]  }
 0x13d   :  { %5072 = vmatpush3.bf16.msra.mxu0 %v5698_v38  ;;  %5094 = vmatpush3.bf16.msra.mxu1 %v5724_v39  ;;  %v5769_v38 = vld [vmem:[#allocation7 + $0xd0] ss:$20 sps:$4 sm:$0xff]  }
 0x13e   :  { %5073 = vmatprep.subr.bf16.mxu0 %v5699_v40  ;;  %5095 = vmatprep.subr.bf16.mxu1 %v5726_v41  ;;  %v5777_v39 = vld [vmem:[#allocation7 + $0xfc] ss:$20 sps:$4 sm:$0xff]   ;;  %v5802_v40 = vld [vmem:[#allocation7 + $0x1b8] ss:$20 sps:$4 sm:$0xff]  }
 0x13f   :  { %v5810_v41 = vld [vmem:[#allocation7 + $0x1e4] ss:$20 sps:$4 sm:$0xff]  }
 0x141   :  { %5074 = vmatpush3.bf16.msra.mxu0 %v5700_v42  ;;  %5096 = vmatpush3.bf16.msra.mxu1 %v5728_v43  ;;  %v5775_v42 = vld [vmem:[#allocation7 + $0xf8] ss:$20 sps:$4 sm:$0xff]  }
 0x142   :  { %5075 = vmatprep.subr.bf16.mxu0 %v5701_v44  ;;  %5097 = vmatprep.subr.bf16.mxu1 %v5730_v45  ;;  %v5783_v43 = vld [vmem:[#allocation7 + $0x124] ss:$20 sps:$4 sm:$0xff]   ;;  %v5808_v44 = vld [vmem:[#allocation7 + $0x1e0] ss:$20 sps:$4 sm:$0xff]  }
 0x143   :  { %v5816_v45 = vld [vmem:[#allocation7 + $0x20c] ss:$20 sps:$4 sm:$0xff]  }
 0x145   :  { %5076 = vmatpush3.bf16.msra.mxu0 %v5702_v46  ;;  %5098 = vmatpush3.bf16.msra.mxu1 %v5732_v47  ;;  %v5781_v46 = vld [vmem:[#allocation7 + $0x120] ss:$20 sps:$4 sm:$0xff]  }
 0x146   :  { %5105 = vmatprep.subr.bf16.mxu0 %v5705_v48  ;;  %5244 = vmatprep.subr.bf16.mxu1 %v6218_v53  ;;  %v5789_v47 = vld [vmem:[#allocation7 + $0x14c] ss:$20 sps:$4 sm:$0xff]   ;;  %v5814_v48 = vld [vmem:[#allocation7 + $0x208] ss:$20 sps:$4 sm:$0xff]  }
 0x148   :  { %2121 = vmatmul.mubr.bf16.vlgmr.msra.gmra.mrb[4].mxu0 %v6065_v55  ;;  %2162 = vmatmul.mubr.bf16.vlgmr.msra.gmra.mrb[4].mxu1 %v6349_v5  ;;  %v5750_v5 = vld [vmem:[#allocation7 + $0x54] ss:$20 sps:$4 sm:$0xff]   ;;  %v5793_v55 = vld [vmem:[#allocation7 + $0x170] ss:$20 sps:$4 sm:$0xff]  }
 0x149   :  { %5106 = vmatpush3.bf16.msra.mxu0 %v5707_v49  ;;  %2202 = vmatprep.mubr.bf16.mxu0 %v6353_v12  ;;  %v5723_v12 = vld [vmem:[#allocation5 + $0x5b0] ss:$20 sps:$4 sm:$0xff]  }
 0x14a   :  { %5107 = vmatprep.subr.bf16.mxu0 %v5709_v50  ;;  %5245 = vmatpush3.bf16.msra.mxu1 %v5735_v51  ;;  %v5822_v49 = vld [vmem:[#allocation7 + $0x234] ss:$20 sps:$4 sm:$0xff]  }
 0x14b   :  { %5246 = vmatprep.mubr.msk.bf16.mxu1 %vm6219_vm1, %v6218_v53  ;;  %3574 = vmatprep.subr.bf16.mxu1 %v5738_v52  ;;  %v5787_v50 = vld [vmem:[#allocation7 + $0x148] ss:$20 sps:$4 sm:$0xff]   ;;  %v5820_v52 = vld [vmem:[#allocation7 + $0x230] ss:$20 sps:$4 sm:$0xff]  }
 0x14c   :  { %v5795_v51 = vld [vmem:[#allocation7 + $0x174] ss:$20 sps:$4 sm:$0xff]  }
 0x14d   :  { %5108 = vmatpush3.bf16.msra.mxu0 %v5711_v54  ;;  %v5828_v54 = vld [vmem:[#allocation7 + $0x25c] ss:$20 sps:$4 sm:$0xff]  }
 0x14e   :  { %5109 = vmatprep.subr.bf16.mxu0 %v5713_v56  ;;  %v5801_v56 = vld [vmem:[#allocation7 + $0x19c] ss:$20 sps:$4 sm:$0xff]  }
 0x150   :  { %5247 = vmatmul.mubr.msk.bf16.vlgmr.msra.gmra.mrb[8].mxu1 %vm1740_vm0, %v6363_v16  ;;  %v5766_v16 = vld [vmem:[#allocation7 + $0xc8] ss:$20 sps:$4 sm:$0xff]  }
 0x151   :  { %5110 = vmatpush3.bf16.msra.mxu0 %v5715_v57  ;;  %3575 = vmatpush1.bf16.msra.mxu1 %v5736_v58  ;;  %v5826_v57 = vld [vmem:[#allocation7 + $0x258] ss:$20 sps:$4 sm:$0xff]  }
 0x152   :  { %5111 = vmatprep.subr.bf16.mxu0 %v5717_v59  ;;  %3576 = vmatprep.subr.bf16.mxu1 %v5744_v60  ;;  %v5834_v58 = vld [vmem:[#allocation7 + $0x284] ss:$20 sps:$4 sm:$0xff]  }
 0x153   :  { %v5799_v59 = vld [vmem:[#allocation7 + $0x198] ss:$20 sps:$4 sm:$0xff]  }
 0x154   :  { %v5807_v60 = vld [vmem:[#allocation7 + $0x1c4] ss:$20 sps:$4 sm:$0xff]  }
 0x155   :  { %5112 = vmatpush3.bf16.msra.mxu0 %v5719_v61  ;;  %3577 = vmatpush1.bf16.msra.mxu1 %v5742_v62  ;;  %v5805_v61 = vld [vmem:[#allocation7 + $0x1c0] ss:$20 sps:$4 sm:$0xff]  }
 0x156   :  { %5113 = vmatprep.subr.bf16.mxu0 %v5721_v63  ;;  %3578 = vmatprep.subr.bf16.mxu1 %v5750_v5  ;;  %v5813_v62 = vld [vmem:[#allocation7 + $0x1ec] ss:$20 sps:$4 sm:$0xff]   ;;  %v5811_v63 = vld [vmem:[#allocation7 + $0x1e8] ss:$20 sps:$4 sm:$0xff]  }
 0x157   :  { %v5819_v5 = vld [vmem:[#allocation7 + $0x214] ss:$20 sps:$4 sm:$0xff]  }
 0x159   :  { %5114 = vmatpush3.bf16.msra.mxu0 %v5723_v12  ;;  %3579 = vmatpush1.bf16.msra.mxu1 %v5748_v0  ;;  %v5817_v12 = vld [vmem:[#allocation7 + $0x210] ss:$20 sps:$4 sm:$0xff]  }
 0x15a   :  { %5115 = vmatprep.subr.bf16.mxu0 %v5725_v1  ;;  %3580 = vmatprep.subr.bf16.mxu1 %v5756_v2  ;;  %v5825_v0 = vld [vmem:[#allocation7 + $0x23c] ss:$20 sps:$4 sm:$0xff]   ;;  %v5823_v1 = vld [vmem:[#allocation7 + $0x238] ss:$20 sps:$4 sm:$0xff]  }
 0x15b   :  { %v5831_v2 = vld [vmem:[#allocation7 + $0x264] ss:$20 sps:$4 sm:$0xff]  }
 0x15d   :  { %5116 = vmatpush3.bf16.msra.mxu0 %v5727_v3  ;;  %3581 = vmatpush1.bf16.msra.mxu1 %v5754_v4  ;;  %v5829_v3 = vld [vmem:[#allocation7 + $0x260] ss:$20 sps:$4 sm:$0xff]  }
 0x15e   :  { %5117 = vmatprep.subr.bf16.mxu0 %v5729_v6  ;;  %3582 = vmatprep.subr.bf16.mxu1 %v5762_v7  ;;  %v5837_v4 = vld [vmem:[#allocation7 + $0x28c] ss:$20 sps:$4 sm:$0xff]   ;;  %v406_v6 = vlaneseq }
 0x160   :  { %v6378_v7 = vshrl.u32 %v406_v6, 7  ;;  %v5870_v6 = vld [vmem:[#allocation7 + $0x374] ss:$20 sps:$4 sm:$0xff]  }
 0x161   :  { %5118 = vmatpush3.bf16.msra.mxu0 %v5731_v8  ;;  %3583 = vmatpush1.bf16.msra.mxu1 %v5760_v10 }
 0x162   :  { %5119 = vmatprep.subr.bf16.mxu0 %v5733_v11  ;;  %3584 = vmatprep.subr.bf16.mxu1 %v5768_v13  ;;  %v408_v8 = vsub.s32 0, %v6378_v7  ;;  %v416_v10 = vsub.s32 2, %v6378_v7  ;;  %v6385_v11 = vld [vmem:[%s6507_s2] sm:$0x1f]  ;;  %v412_v13 = vsub.s32 1, %v6378_v7 }
 0x165   :  { %5120 = vmatpush3.bf16.msra.mxu0 %v5734_v14  ;;  %3585 = vmatpush1.bf16.msra.mxu1 %v5766_v16  ;;  %v420_v14 = vsub.s32 3, %v6378_v7  ;;  %v409_v16 = vrot.slane %v6385_v11, %v408_v8 }
 0x166   :  { %3703 = vmatprep.subr.bf16.mxu0 %v5741_v17  ;;  %3586 = vmatprep.subr.bf16.mxu1 %v5774_v18  ;;  %v417_v17 = vrot.slane %v6385_v11, %v416_v10  ;;  %v413_v18 = vrot.slane %v6385_v11, %v412_v13 }
 0x168   :  { %2203 = vmatmul.mubr.bf16.vlgmr.msra.gmra.mrb[8].mxu0 %v6357_v9  ;;  %v5763_v9 = vld [vmem:[#allocation7 + $0xa8] ss:$20 sps:$4 sm:$0xff]  }
 0x169   :  { %3704 = vmatpush1.bf16.msra.mxu0 %v5739_v19  ;;  %3587 = vmatpush1.bf16.msra.mxu1 %v5772_v20  ;;  %v421_v19 = vrot.slane %v6385_v11, %v420_v14 }
 0x16a   :  { %3705 = vmatprep.subr.bf16.mxu0 %v5747_v21  ;;  %3588 = vmatprep.subr.bf16.mxu1 %v5780_v22 }
 0x16d   :  { %3706 = vmatpush1.bf16.msra.mxu0 %v5745_v23  ;;  %3589 = vmatpush1.bf16.msra.mxu1 %v5778_v24 }
 0x16e   :  { %3707 = vmatprep.subr.bf16.mxu0 %v5753_v25  ;;  %3590 = vmatprep.subr.bf16.mxu1 %v5786_v26 }
 0x171   :  { %3708 = vmatpush1.bf16.msra.mxu0 %v5751_v27  ;;  %3591 = vmatpush1.bf16.msra.mxu1 %v5784_v28 }
 0x172   :  { %3709 = vmatprep.subr.bf16.mxu0 %v5759_v29  ;;  %3592 = vmatprep.subr.bf16.mxu1 %v5792_v31 }
 0x175   :  { %3710 = vmatpush1.bf16.msra.mxu0 %v5757_v32  ;;  %3593 = vmatpush1.bf16.msra.mxu1 %v5790_v33 }
 0x176   :  { %3711 = vmatprep.subr.bf16.mxu0 %v5765_v34  ;;  %3594 = vmatprep.subr.bf16.mxu1 %v5798_v35 }
 0x179   :  { %3712 = vmatpush1.bf16.msra.mxu0 %v5763_v9  ;;  %3595 = vmatpush1.bf16.msra.mxu1 %v5796_v36 }
 0x17a   :  { %3713 = vmatprep.subr.bf16.mxu0 %v5771_v30  ;;  %3596 = vmatprep.subr.bf16.mxu1 %v5804_v37 }
 0x17d   :  { %3714 = vmatpush1.bf16.msra.mxu0 %v5769_v38  ;;  %3597 = vmatpush1.bf16.msra.mxu1 %v5802_v40 }
 0x17e   :  { %3715 = vmatprep.subr.bf16.mxu0 %v5777_v39  ;;  %3598 = vmatprep.subr.bf16.mxu1 %v5810_v41 }
 0x181   :  { %3716 = vmatpush1.bf16.msra.mxu0 %v5775_v42  ;;  %3599 = vmatpush1.bf16.msra.mxu1 %v5808_v44 }
 0x182   :  { %3717 = vmatprep.subr.bf16.mxu0 %v5783_v43  ;;  %3600 = vmatprep.subr.bf16.mxu1 %v5816_v45 }
 0x185   :  { %3718 = vmatpush1.bf16.msra.mxu0 %v5781_v46  ;;  %3601 = vmatpush1.bf16.msra.mxu1 %v5814_v48  ;;  %v5835_v48 = vld [vmem:[#allocation7 + $0x288] ss:$20 sps:$4 sm:$0xff]  }
 0x186   :  { %3719 = vmatprep.subr.bf16.mxu0 %v5789_v47  ;;  %3602 = vmatprep.subr.bf16.mxu1 %v5822_v49  ;;  %v5832_v47 = vld [vmem:[#allocation7 + $0x280] ss:$20 sps:$4 sm:$0xff]  }
 0x187   :  { %v5840_v49 = vld [vmem:[#allocation7 + $0x2ac] ss:$20 sps:$4 sm:$0xff]  }
 0x189   :  { %3720 = vmatpush1.bf16.msra.mxu0 %v5787_v50  ;;  %3603 = vmatpush1.bf16.msra.mxu1 %v5820_v52  ;;  %v5843_v50 = vld [vmem:[#allocation7 + $0x2b4] ss:$20 sps:$4 sm:$0xff]   ;;  %v5841_v52 = vld [vmem:[#allocation7 + $0x2b0] ss:$20 sps:$4 sm:$0xff]  }
 0x18a   :  { %3721 = vmatprep.subr.bf16.mxu0 %v5795_v51  ;;  %3604 = vmatprep.subr.bf16.mxu1 %v5828_v54  ;;  %v5838_v51 = vld [vmem:[#allocation7 + $0x2a8] ss:$20 sps:$4 sm:$0xff]  }
 0x18b   :  { %v5846_v54 = vld [vmem:[#allocation7 + $0x2d4] ss:$20 sps:$4 sm:$0xff]  }
 0x18d   :  { %3722 = vmatpush1.bf16.msra.mxu0 %v5793_v55  ;;  %3605 = vmatpush1.bf16.msra.mxu1 %v5826_v57  ;;  %v5849_v55 = vld [vmem:[#allocation7 + $0x2dc] ss:$20 sps:$4 sm:$0xff]   ;;  %v5847_v57 = vld [vmem:[#allocation7 + $0x2d8] ss:$20 sps:$4 sm:$0xff]  }
 0x18e   :  { %3723 = vmatprep.subr.bf16.mxu0 %v5801_v56  ;;  %3617 = vmatprep.subr.bf16.mxu1 %v5834_v58  ;;  %v5844_v56 = vld [vmem:[#allocation7 + $0x2d0] ss:$20 sps:$4 sm:$0xff]  }
 0x18f   :  { %v5852_v58 = vld [vmem:[#allocation7 + $0x2fc] ss:$20 sps:$4 sm:$0xff]  }
 0x191   :  { %3724 = vmatpush1.bf16.msra.mxu0 %v5799_v59  ;;  %v5855_v59 = vld [vmem:[#allocation7 + $0x304] ss:$20 sps:$4 sm:$0xff]  }
 0x192   :  { %3725 = vmatprep.subr.bf16.mxu0 %v5807_v60  ;;  %v5850_v60 = vld [vmem:[#allocation7 + $0x2f8] ss:$20 sps:$4 sm:$0xff]  }
 0x195   :  { %3726 = vmatpush1.bf16.msra.mxu0 %v5805_v61  ;;  %v5853_v61 = vld [vmem:[#allocation7 + $0x300] ss:$20 sps:$4 sm:$0xff]  }
 0x196   :  { %3727 = vmatprep.subr.bf16.mxu0 %v5813_v62  ;;  %v5858_v62 = vld [vmem:[#allocation7 + $0x324] ss:$20 sps:$4 sm:$0xff]  }
 0x199   :  { %3728 = vmatpush1.bf16.msra.mxu0 %v5811_v63  ;;  %v5861_v63 = vld [vmem:[#allocation7 + $0x32c] ss:$20 sps:$4 sm:$0xff]  }
 0x19a   :  { %3729 = vmatprep.subr.bf16.mxu0 %v5819_v5  ;;  %v5856_v5 = vld [vmem:[#allocation7 + $0x320] ss:$20 sps:$4 sm:$0xff]  }
 0x19d   :  { %3730 = vmatpush1.bf16.msra.mxu0 %v5817_v12  ;;  %v5859_v12 = vld [vmem:[#allocation7 + $0x328] ss:$20 sps:$4 sm:$0xff]  }
 0x19e   :  { %3731 = vmatprep.subr.bf16.mxu0 %v5825_v0  ;;  %v5864_v0 = vld [vmem:[#allocation7 + $0x34c] ss:$20 sps:$4 sm:$0xff]  }
 0x1a1   :  { %3732 = vmatpush1.bf16.msra.mxu0 %v5823_v1  ;;  %v5867_v1 = vld [vmem:[#allocation7 + $0x354] ss:$20 sps:$4 sm:$0xff]  }
 0x1a2   :  { %3733 = vmatprep.subr.bf16.mxu0 %v5831_v2  ;;  %v5862_v2 = vld [vmem:[#allocation7 + $0x348] ss:$20 sps:$4 sm:$0xff]  }
 0x1a5   :  { %3734 = vmatpush1.bf16.msra.mxu0 %v5829_v3  ;;  %v5865_v3 = vld [vmem:[#allocation7 + $0x350] ss:$20 sps:$4 sm:$0xff]  }
 0x1a6   :  { %3746 = vmatprep.subr.bf16.mxu0 %v5837_v4  ;;  %v424_v4 = vsub.s32 4, %v6378_v7 }
 0x1fb   :  { %v1907_v20 = vpop.f32.mrb[0].mxu0  ;;  %v2079_v21 = vpop.f32.mrb[0].mxu1 }
 0x1fc   :  { %v5310_v22 = vadd.f32 %v1907_v20, %v409_v16  ;;  %v5314_v23 = vadd.f32 %v2079_v21, %v417_v17  ;;  %v1909_v24 = vpop.f32.mrb[1].mxu0  ;;  %v2081_v25 = vpop.f32.mrb[1].mxu1  ;;  %v425_v20 = vrot.slane %v6385_v11, %v424_v4 }
 0x1fd   :  { %v5311_v26 = vadd.f32 %v1909_v24, %v413_v18  ;;  %v5315_v27 = vadd.f32 %v2081_v25, %v421_v19  ;;  %v1911_v28 = vpop.f32.mrb[2].mxu0  ;;  %v2083_v29 = vpop.f32.mrb[2].mxu1 }
 0x1fe   :  { %v5312_v31 = vadd.f32 %v1911_v28, %v409_v16  ;;  %v5316_v32 = vadd.f32 %v2083_v29, %v417_v17  ;;  %v1913_v33 = vpop.f32.mrb[3].mxu0  ;;  %v2085_v34 = vpop.f32.mrb[3].mxu1  ;;  %v2252_v36 = vmax.f32 %v5310_v22, 0.0  ;;  %v2254_v30 = vmax.f32 %v5314_v23, 0.0  ;;  %v5873_v16 = vld [vmem:[#allocation7 + $0x37c] ss:$20 sps:$4 sm:$0xff]  }
 0x1ff   :  { %v5313_v35 = vadd.f32 %v1913_v33, %v413_v18  ;;  %v5317_v9 = vadd.f32 %v2085_v34, %v421_v19  ;;  %v2253_v39 = vmax.f32 %v5311_v26, 0.0  ;;  %v2255_v40 = vmax.f32 %v5315_v27, 0.0  ;;  %v5868_v17 = vld [vmem:[#allocation7 + $0x370] ss:$20 sps:$4 sm:$0xff]   ;;  %v5871_v18 = vld [vmem:[#allocation7 + $0x378] ss:$20 sps:$4 sm:$0xff]  }
 0x200   :  { %v2257_v37 = vmax.f32 %v5312_v31, 0.0  ;;  %v2259_v38 = vmax.f32 %v5316_v32, 0.0  ;;  %v5876_v22 = vld [vmem:[#allocation7 + $0x39c] ss:$20 sps:$4 sm:$0xff]   ;;  %v5879_v23 = vld [vmem:[#allocation7 + $0x3a4] ss:$20 sps:$4 sm:$0xff]  }
 0x201   :  { %v2258_v41 = vmax.f32 %v5313_v35, 0.0  ;;  %v2260_v42 = vmax.f32 %v5317_v9, 0.0  ;;  %v5874_v33 = vld [vmem:[#allocation7 + $0x398] ss:$20 sps:$4 sm:$0xff]   ;;  %v5877_v34 = vld [vmem:[#allocation7 + $0x3a0] ss:$20 sps:$4 sm:$0xff]  }
 0x202   :  { %v6401_v43 = vpack.c.bf16 %v2257_v37, %v2252_v36  ;;  %v6403_v44 = vpack.c.bf16 %v2259_v38, %v2254_v30  ;;  %v5882_v36 = vld [vmem:[#allocation7 + $0x3c4] ss:$20 sps:$4 sm:$0xff]   ;;  %v5885_v30 = vld [vmem:[#allocation7 + $0x3cc] ss:$20 sps:$4 sm:$0xff]  }
 0x203   :  { %v6405_v45 = vpack.c.bf16 %v2258_v41, %v2253_v39  ;;  %v6407_v46 = vpack.c.bf16 %v2260_v42, %v2255_v40  ;;  %v5880_v39 = vld [vmem:[#allocation7 + $0x3c0] ss:$20 sps:$4 sm:$0xff]   ;;  %v5883_v40 = vld [vmem:[#allocation7 + $0x3c8] ss:$20 sps:$4 sm:$0xff]  }
 0x205   :  { %3606 = vmatprep.mubr.bf16.mxu1 %v6405_v45  ;;  %3735 = vmatprep.mubr.bf16.mxu0 %v6405_v45 }
 0x206   :  { %3607 = vmatmul.mubr.bf16.vlgmr.msra.gmra.mrb[12].mxu1 %v6401_v43  ;;  %3736 = vmatmul.mubr.bf16.vlgmr.msra.gmra.mrb[12].mxu0 %v6401_v43 }
 0x207   :  { %3618 = vmatpush1.bf16.msra.mxu1 %v5832_v47  ;;  %3747 = vmatpush1.bf16.msra.mxu0 %v5835_v48  ;;  %v5888_v47 = vld [vmem:[#allocation7 + $0x3ec] ss:$20 sps:$4 sm:$0xff]   ;;  %v5891_v48 = vld [vmem:[#allocation7 + $0x3f4] ss:$20 sps:$4 sm:$0xff]  }
 0x208   :  { %3649 = vmatprep.mubr.bf16.mxu1 %v6407_v46  ;;  %3778 = vmatprep.mubr.bf16.mxu0 %v6407_v46 }
 0x209   :  { %3619 = vmatprep.subr.bf16.mxu1 %v5840_v49  ;;  %3748 = vmatprep.subr.bf16.mxu0 %v5843_v50 }
 0x20b   :  { %3620 = vmatpush1.bf16.msra.mxu1 %v5838_v51  ;;  %3749 = vmatpush1.bf16.msra.mxu0 %v5841_v52  ;;  %v5886_v52 = vld [vmem:[#allocation7 + $0x3e8] ss:$20 sps:$4 sm:$0xff]  }
 0x20c   :  { %3621 = vmatprep.subr.bf16.mxu1 %v5846_v54  ;;  %3750 = vmatprep.subr.bf16.mxu0 %v5849_v55  ;;  %v5889_v54 = vld [vmem:[#allocation7 + $0x3f0] ss:$20 sps:$4 sm:$0xff]   ;;  %v5894_v55 = vld [vmem:[#allocation7 + $0x414] ss:$20 sps:$4 sm:$0xff]  }
 0x20f   :  { %3622 = vmatpush1.bf16.msra.mxu1 %v5844_v56  ;;  %3751 = vmatpush1.bf16.msra.mxu0 %v5847_v57  ;;  %v5897_v56 = vld [vmem:[#allocation7 + $0x41c] ss:$20 sps:$4 sm:$0xff]  }
 0x210   :  { %3623 = vmatprep.subr.bf16.mxu1 %v5852_v58  ;;  %3752 = vmatprep.subr.bf16.mxu0 %v5855_v59  ;;  %v5892_v57 = vld [vmem:[#allocation7 + $0x410] ss:$20 sps:$4 sm:$0xff]   ;;  %v5895_v58 = vld [vmem:[#allocation7 + $0x418] ss:$20 sps:$4 sm:$0xff]  }
 0x211   :  { %v5900_v59 = vld [vmem:[#allocation7 + $0x43c] ss:$20 sps:$4 sm:$0xff]  }
 0x213   :  { %3624 = vmatpush1.bf16.msra.mxu1 %v5850_v60  ;;  %3753 = vmatpush1.bf16.msra.mxu0 %v5853_v61  ;;  %v5903_v60 = vld [vmem:[#allocation7 + $0x444] ss:$20 sps:$4 sm:$0xff]  }
 0x214   :  { %3625 = vmatprep.subr.bf16.mxu1 %v5858_v62  ;;  %3754 = vmatprep.subr.bf16.mxu0 %v5861_v63  ;;  %v5898_v61 = vld [vmem:[#allocation7 + $0x438] ss:$20 sps:$4 sm:$0xff]   ;;  %v5901_v62 = vld [vmem:[#allocation7 + $0x440] ss:$20 sps:$4 sm:$0xff]  }
 0x215   :  { %v5906_v63 = vld [vmem:[#allocation7 + $0x464] ss:$20 sps:$4 sm:$0xff]  }
 0x217   :  { %3626 = vmatpush1.bf16.msra.mxu1 %v5856_v5  ;;  %3755 = vmatpush1.bf16.msra.mxu0 %v5859_v12  ;;  %v5909_v5 = vld [vmem:[#allocation7 + $0x46c] ss:$20 sps:$4 sm:$0xff]  }
 0x218   :  { %3627 = vmatprep.subr.bf16.mxu1 %v5864_v0  ;;  %3756 = vmatprep.subr.bf16.mxu0 %v5867_v1  ;;  %v5904_v12 = vld [vmem:[#allocation7 + $0x460] ss:$20 sps:$4 sm:$0xff]   ;;  %v5907_v0 = vld [vmem:[#allocation7 + $0x468] ss:$20 sps:$4 sm:$0xff]  }
 0x219   :  { %v5912_v1 = vld [vmem:[#allocation7 + $0x48c] ss:$20 sps:$4 sm:$0xff]  }
 0x21b   :  { %3628 = vmatpush1.bf16.msra.mxu1 %v5862_v2  ;;  %3757 = vmatpush1.bf16.msra.mxu0 %v5865_v3  ;;  %v5077_v19 = vpop.f32.mrb[4].mxu0  ;;  %v5099_v21 = vpop.f32.mrb[4].mxu1  ;;  %v5915_v2 = vld [vmem:[#allocation7 + $0x494] ss:$20 sps:$4 sm:$0xff]  }
 0x21c   :  { %3629 = vmatprep.subr.bf16.mxu1 %v5870_v6  ;;  %3758 = vmatprep.subr.bf16.mxu0 %v5873_v16  ;;  %v5078_v24 = vpop.f32.mrb[5].mxu0  ;;  %v5100_v25 = vpop.f32.mrb[5].mxu1  ;;  %v5910_v3 = vld [vmem:[#allocation7 + $0x488] ss:$20 sps:$4 sm:$0xff]   ;;  %v5913_v6 = vld [vmem:[#allocation7 + $0x490] ss:$20 sps:$4 sm:$0xff]  }
 0x21d   :  { %v5079_v26 = vadd.f32 %v5078_v24, %v5077_v19  ;;  %v5080_v27 = vpop.f32.mrb[6].mxu0  ;;  %v5101_v28 = vadd.f32 %v5100_v25, %v5099_v21  ;;  %v5102_v29 = vpop.f32.mrb[6].mxu1  ;;  %v5918_v16 = vld [vmem:[#allocation7 + $0x4b4] ss:$20 sps:$4 sm:$0xff]   ;;  %v5916_v19 = vld [vmem:[#allocation7 + $0x4b0] ss:$20 sps:$4 sm:$0xff]  }
 0x21e   :  { %v5081_v31 = vpop.f32.mrb[7].mxu0  ;;  %v5103_v32 = vpop.f32.mrb[7].mxu1 }
 0x21f   :  { %3630 = vmatpush1.bf16.msra.mxu1 %v5868_v17  ;;  %3759 = vmatpush1.bf16.msra.mxu0 %v5871_v18  ;;  %v2123_v35 = vadd.f32 %v5079_v26, %v425_v20  ;;  %v5082_v9 = vadd.f32 %v5081_v31, %v5080_v27  ;;  %v5104_v11 = vadd.f32 %v5103_v32, %v5102_v29  ;;  %v5921_v17 = vld [vmem:[#allocation7 + $0x4bc] ss:$20 sps:$4 sm:$0xff]   ;;  %v5922_v29 = vld [vmem:[#allocation7 + $0x4d8] ss:$20 sps:$4 sm:$0xff]   ;;  %v5925_v31 = vld [vmem:[#allocation7 + $0x4e0] ss:$20 sps:$4 sm:$0xff]  }
 0x220   :  { %3631 = vmatprep.subr.bf16.mxu1 %v5876_v22  ;;  %3760 = vmatprep.subr.bf16.mxu0 %v5879_v23  ;;  %v5924_v22 = vld [vmem:[#allocation7 + $0x4dc] ss:$20 sps:$4 sm:$0xff]   ;;  %v5927_v23 = vld [vmem:[#allocation7 + $0x4e4] ss:$20 sps:$4 sm:$0xff]  }
 0x221   :  { %v2126_v37 = vadd.f32 %v5082_v9, %v425_v20  ;;  %v6419_v38 = vadd.f32 %v5101_v28, %v2123_v35  ;;  %v5919_v20 = vld [vmem:[#allocation7 + $0x4b8] ss:$20 sps:$4 sm:$0xff]  }
 0x222   :  { %v5930_v32 = vld [vmem:[#allocation7 + $0x504] ss:$20 sps:$4 sm:$0xff]  }
 0x223   :  { %3632 = vmatpush1.bf16.msra.mxu1 %v5874_v33  ;;  %3761 = vmatpush1.bf16.msra.mxu0 %v5877_v34  ;;  %v6421_v41 = vadd.f32 %v5104_v11, %v2126_v37  ;;  %v6423_v42 = vpop.f32.mrb[8].mxu1  ;;  %v5933_v33 = vld [vmem:[#allocation7 + $0x50c] ss:$20 sps:$4 sm:$0xff]  }
 0x224   :  { %3633 = vmatprep.subr.bf16.mxu1 %v5882_v36  ;;  %3762 = vmatprep.subr.bf16.mxu0 %v5885_v30  ;;  %v5248_v49 = vpop.f32.mrb[9].mxu1  ;;  %v5928_v36 = vld [vmem:[#allocation7 + $0x500] ss:$20 sps:$4 sm:$0xff]   ;;  %v5931_v30 = vld [vmem:[#allocation7 + $0x508] ss:$20 sps:$4 sm:$0xff]  }
 0x225   :  { %v6425_v50 = vpop.f32.mrb[10].mxu1  ;;  %v5936_v37 = vld [vmem:[#allocation7 + $0x52c] ss:$20 sps:$4 sm:$0xff]   ;;  %v5940_v49 = vld [vmem:[#allocation7 + $0x550] ss:$20 sps:$4 sm:$0xff]  }
 0x226   :  { %v5249_v51 = vpop.f32.mrb[11].mxu1 }
 0x227   :  { %3634 = vmatpush1.bf16.msra.mxu1 %v5880_v39  ;;  %3763 = vmatpush1.bf16.msra.mxu0 %v5883_v40  ;;  %v5948_v51 = vld [vmem:[#allocation7 + $0x57c] ss:$20 sps:$4 sm:$0xff]  }
 0x228   :  { %3635 = vmatprep.subr.bf16.mxu1 %v5888_v47  ;;  %3764 = vmatprep.subr.bf16.mxu0 %v5891_v48  ;;  %v5942_v47 = vld [vmem:[#allocation7 + $0x554] ss:$20 sps:$4 sm:$0xff]   ;;  %v5945_v48 = vld [vmem:[#allocation7 + $0x55c] ss:$20 sps:$4 sm:$0xff]  }
 0x22b   :  { %3636 = vmatpush1.bf16.msra.mxu1 %v5886_v52  ;;  %3765 = vmatpush1.bf16.msra.mxu0 %v5889_v54  ;;  %v5951_v52 = vld [vmem:[#allocation7 + $0x584] ss:$20 sps:$4 sm:$0xff]  }
 0x22c   :  { %3637 = vmatprep.subr.bf16.mxu1 %v5894_v55  ;;  %3766 = vmatprep.subr.bf16.mxu0 %v5897_v56  ;;  %v5946_v54 = vld [vmem:[#allocation7 + $0x578] ss:$20 sps:$4 sm:$0xff]   ;;  %v5949_v55 = vld [vmem:[#allocation7 + $0x580] ss:$20 sps:$4 sm:$0xff]  }
 0x22d   :  { %v5954_v56 = vld [vmem:[#allocation7 + $0x5a4] ss:$20 sps:$4 sm:$0xff]  }
 0x22f   :  { %3638 = vmatpush1.bf16.msra.mxu1 %v5892_v57  ;;  %3767 = vmatpush1.bf16.msra.mxu0 %v5895_v58  ;;  %v5957_v57 = vld [vmem:[#allocation7 + $0x5ac] ss:$20 sps:$4 sm:$0xff]  }
 0x230   :  { %3639 = vmatprep.subr.bf16.mxu1 %v5900_v59  ;;  %3768 = vmatprep.subr.bf16.mxu0 %v5903_v60  ;;  %v5952_v58 = vld [vmem:[#allocation7 + $0x5a0] ss:$20 sps:$4 sm:$0xff]  }
 0x231   :  { %v5960_v59 = vld [vmem:[#allocation7 + $0x5cc] ss:$20 sps:$4 sm:$0xff]   ;;  %v5963_v60 = vld [vmem:[#allocation7 + $0x5d4] ss:$20 sps:$4 sm:$0xff]  }
 0x233   :  { %3640 = vmatpush1.bf16.msra.mxu1 %v5898_v61  ;;  %3769 = vmatpush1.bf16.msra.mxu0 %v5901_v62  ;;  %v5958_v61 = vld [vmem:[#allocation7 + $0x5c8] ss:$20 sps:$4 sm:$0xff]   ;;  %v5961_v62 = vld [vmem:[#allocation7 + $0x5d0] ss:$20 sps:$4 sm:$0xff]  }
 0x234   :  { %3641 = vmatprep.subr.bf16.mxu1 %v5906_v63  ;;  %3770 = vmatprep.subr.bf16.mxu0 %v5909_v5  ;;  %v5966_v63 = vld [vmem:[#allocation7 + $0x5f4] ss:$20 sps:$4 sm:$0xff]   ;;  %v5969_v5 = vld [vmem:[#allocation7 + $0x5fc] ss:$20 sps:$4 sm:$0xff]  }
 0x237   :  { %3642 = vmatpush1.bf16.msra.mxu1 %v5904_v12  ;;  %3771 = vmatpush1.bf16.msra.mxu0 %v5907_v0  ;;  %v5964_v12 = vld [vmem:[#allocation7 + $0x5f0] ss:$20 sps:$4 sm:$0xff]   ;;  %v5967_v0 = vld [vmem:[#allocation7 + $0x5f8] ss:$20 sps:$4 sm:$0xff]  }
 0x238   :  { %3643 = vmatprep.subr.bf16.mxu1 %v5912_v1  ;;  %3772 = vmatprep.subr.bf16.mxu0 %v5915_v2  ;;  %v5972_v1 = vld [vmem:[#allocation7 + $0x61c] ss:$20 sps:$4 sm:$0xff]   ;;  %v5975_v2 = vld [vmem:[#allocation7 + $0x624] ss:$20 sps:$4 sm:$0xff]  }
 0x23b   :  { %3644 = vmatpush1.bf16.msra.mxu1 %v5910_v3  ;;  %3773 = vmatpush1.bf16.msra.mxu0 %v5913_v6  ;;  %v5121_v18 = vpop.f32.mrb[8].mxu0  ;;  %v5970_v3 = vld [vmem:[#allocation7 + $0x618] ss:$20 sps:$4 sm:$0xff]   ;;  %v5973_v6 = vld [vmem:[#allocation7 + $0x620] ss:$20 sps:$4 sm:$0xff]  }
 0x23c   :  { %v5122_v21 = vpop.f32.mrb[9].mxu0  ;;  %3645 = vmatprep.subr.bf16.mxu1 %v5918_v16  ;;  %3774 = vmatprep.subr.bf16.mxu0 %v5921_v17  ;;  %v5976_v16 = vld [vmem:[#allocation7 + $0x150] ss:$20 sps:$4 sm:$0xff]  }
 0x23d   :  { %v5123_v24 = vadd.f32 %v5122_v21, %v5121_v18  ;;  %v5124_v25 = vpop.f32.mrb[10].mxu0  ;;  %v5977_v17 = vld [vmem:[#allocation7 + $0x3d0] ss:$20 sps:$4 sm:$0xff]   ;;  %v5981_v21 = vld [vmem:[#allocation7 + $0x3f8] ss:$20 sps:$4 sm:$0xff]  }
 0x23e   :  { %v5125_v26 = vpop.f32.mrb[11].mxu0  ;;  %v5978_v18 = vld [vmem:[#allocation7 + $0x10] ss:$20 sps:$4 sm:$0xff]  }
 0x23f   :  { %v5126_v27 = vadd.f32 %v5125_v26, %v5124_v25  ;;  %3646 = vmatpush1.bf16.msra.mxu1 %v5916_v19  ;;  %3775 = vmatpush1.bf16.msra.mxu0 %v5919_v20  ;;  %v2205_v28 = vadd.f32 %v5123_v24, %v6419_v38  ;;  %v5939_v38 = vld [vmem:[#allocation7 + $0x534] ss:$20 sps:$4 sm:$0xff]   ;;  %v5979_v19 = vld [vmem:[#allocation7 + $0x290] ss:$20 sps:$4 sm:$0xff]   ;;  %v5980_v20 = vld [vmem:[#allocation7 + $0x178] ss:$20 sps:$4 sm:$0xff]  }
 0x240   :  { %3647 = vmatprep.subr.bf16.mxu1 %v5924_v22  ;;  %3776 = vmatprep.subr.bf16.mxu0 %v5927_v23  ;;  %v5982_v22 = vld [vmem:[#allocation7 + $0x38] ss:$20 sps:$4 sm:$0xff]   ;;  %v5984_v24 = vld [vmem:[#allocation7 + $0x1a0] ss:$20 sps:$4 sm:$0xff]  }
 0x241   :  { %v2246_v34 = vadd.f32 %v6423_v42, %v2205_v28  ;;  %v2208_v35 = vadd.f32 %v5126_v27, %v6421_v41  ;;  %v5934_v41 = vld [vmem:[#allocation7 + $0x528] ss:$20 sps:$4 sm:$0xff]   ;;  %v5937_v42 = vld [vmem:[#allocation7 + $0x530] ss:$20 sps:$4 sm:$0xff]   ;;  %v5983_v23 = vld [vmem:[#allocation7 + $0x2b8] ss:$20 sps:$4 sm:$0xff]  }
 0x242   :  { %v5985_v25 = vld [vmem:[#allocation7 + $0x420] ss:$20 sps:$4 sm:$0xff]   ;;  %v5988_v28 = vld [vmem:[#allocation7 + $0x1c8] ss:$20 sps:$4 sm:$0xff]  }
 0x243   :  { %v2256_v9 = vmax.f32 %v2246_v34, 0.0  ;;  %v2249_v11 = vadd.f32 %v6425_v50, %v2208_v35  ;;  %3648 = vmatpush1.bf16.msra.mxu1 %v5922_v29  ;;  %3777 = vmatpush1.bf16.msra.mxu0 %v5925_v31  ;;  %v5943_v50 = vld [vmem:[#allocation7 + $0x558] ss:$20 sps:$4 sm:$0xff]   ;;  %v5986_v26 = vld [vmem:[#allocation7 + $0x60] ss:$20 sps:$4 sm:$0xff]  }
 0x244   :  { %3660 = vmatprep.subr.bf16.mxu1 %v5930_v32  ;;  %3789 = vmatprep.subr.bf16.mxu0 %v5933_v33  ;;  %v5987_v27 = vld [vmem:[#allocation7 + $0x2e0] ss:$20 sps:$4 sm:$0xff]   ;;  %v5989_v29 = vld [vmem:[#allocation7 + $0x448] ss:$20 sps:$4 sm:$0xff]   ;;  %v5992_v32 = vld [vmem:[#allocation7 + $0x1f0] ss:$20 sps:$4 sm:$0xff]  }
 0x245   :  { %v2261_v39 = vmax.f32 %v2249_v11, 0.0  ;;  %v5990_v31 = vld [vmem:[#allocation7 + $0x88] ss:$20 sps:$4 sm:$0xff]   ;;  %v5994_v33 = vld [vmem:[#allocation7 + $0xb0] ss:$20 sps:$4 sm:$0xff]  }
 0x246   :  { %3650 = vmatmul.mubr.bf16.vlgmr.msra.gmra.mrb[12].mxu1 %v6403_v44  ;;  %3779 = vmatmul.mubr.bf16.vlgmr.msra.gmra.mrb[12].mxu0 %v6403_v44  ;;  %v5995_v34 = vld [vmem:[#allocation7 + $0x330] ss:$20 sps:$4 sm:$0xff]   ;;  %v5996_v35 = vld [vmem:[#allocation7 + $0x218] ss:$20 sps:$4 sm:$0xff]  }
 0x247   :  { %v6433_v40 = vpack.c.bf16 %v2261_v39, %v2256_v9  ;;  %3661 = vmatpush1.bf16.msra.mxu1 %v5928_v36  ;;  %3790 = vmatpush1.bf16.msra.mxu0 %v5931_v30  ;;  %v5997_v9 = vld [vmem:[#allocation7 + $0x498] ss:$20 sps:$4 sm:$0xff]   ;;  %v6000_v30 = vld [vmem:[#allocation7 + $0x240] ss:$20 sps:$4 sm:$0xff]  }
 0x248   :  { %3662 = vmatprep.subr.bf16.mxu1 %v5936_v37  ;;  %3791 = vmatprep.subr.bf16.mxu0 %v5939_v38  ;;  %v5998_v11 = vld [vmem:[#allocation7 + $0xd8] ss:$20 sps:$4 sm:$0xff]   ;;  %v6001_v37 = vld [vmem:[#allocation7 + $0x4c0] ss:$20 sps:$4 sm:$0xff]  }
 0x249   :  { %3692 = vmatprep.mubr.bf16.mxu1 %v6217_v15  ;;  %3821 = vmatprep.mubr.bf16.mxu0 %v6217_v15  ;;  %v5955_v15 = vld [vmem:[#allocation7 + $0x5a8] ss:$20 sps:$4 sm:$0xff]   ;;  %v5999_v36 = vld [vmem:[#allocation7 + $0x358] ss:$20 sps:$4 sm:$0xff]   ;;  %v6002_v38 = vld [vmem:[#allocation7 + $0x100] ss:$20 sps:$4 sm:$0xff]  }
 0x24a   :  { %v6003_v39 = vld [vmem:[#allocation7 + $0x380] ss:$20 sps:$4 sm:$0xff]  }
 0x24b   :  { %3663 = vmatpush1.bf16.msra.mxu1 %v5934_v41  ;;  %3792 = vmatpush1.bf16.msra.mxu0 %v5937_v42  ;;  %v6004_v41 = vld [vmem:[#allocation7 + $0x268] ss:$20 sps:$4 sm:$0xff]  }
 0x24c   :  { %3664 = vmatprep.subr.bf16.mxu1 %v5942_v47  ;;  %3793 = vmatprep.subr.bf16.mxu0 %v5945_v48  ;;  %v6005_v42 = vld [vmem:[#allocation7 + $0x4e8] ss:$20 sps:$4 sm:$0xff]  }
 0x24d   :  { %v6006_v47 = vld [vmem:[#allocation7 + $0x128] ss:$20 sps:$4 sm:$0xff]  }
 0x24e   :  { %v6007_v48 = vld [vmem:[#allocation7 + $0x3a8] ss:$20 sps:$4 sm:$0xff]  }
 0x24f   :  { %3665 = vmatpush1.bf16.msra.mxu1 %v5940_v49  ;;  %3794 = vmatpush1.bf16.msra.mxu0 %v5943_v50  ;;  %v6016_v49 = vld [vmem:[#allocation8 + $0x40] sm:$0xff]  }
 0x250   :  { %3666 = vmatprep.subr.bf16.mxu1 %v5948_v51  ;;  %3795 = vmatprep.subr.bf16.mxu0 %v5951_v52  ;;  %v6008_v50 = vld [vmem:[#allocation7 + $0x510] ss:$20 sps:$4 sm:$0xff]   ;;  %v6020_v52 = vld [vmem:[#allocation8 + $0x48] sm:$0xff]  }
 0x251   :  { %v6018_v51 = vld [vmem:[#allocation8] sm:$0xff]  }
 0x253   :  { %3667 = vmatpush1.bf16.msra.mxu1 %v5946_v54  ;;  %3796 = vmatpush1.bf16.msra.mxu0 %v5949_v55  ;;  %v6009_v54 = vld [vmem:[#allocation7 + $0x538] ss:$20 sps:$4 sm:$0xff]  }
 0x254   :  { %3668 = vmatprep.subr.bf16.mxu1 %v5954_v56  ;;  %3797 = vmatprep.subr.bf16.mxu0 %v5957_v57  ;;  %v6022_v55 = vld [vmem:[#allocation8 + $0x8] sm:$0xff]   ;;  %v6024_v56 = vld [vmem:[#allocation8 + $0x50] sm:$0xff]  }
 0x255   :  { %v6010_v57 = vld [vmem:[#allocation7 + $0x560] ss:$20 sps:$4 sm:$0xff]  }
 0x257   :  { %3669 = vmatpush1.bf16.msra.mxu1 %v5952_v58  ;;  %3798 = vmatpush1.bf16.msra.mxu0 %v5955_v15  ;;  %v6028_v58 = vld [vmem:[#allocation8 + $0x58] sm:$0xff]  }
 0x258   :  { %3670 = vmatprep.subr.bf16.mxu1 %v5960_v59  ;;  %3799 = vmatprep.subr.bf16.mxu0 %v5963_v60  ;;  %v6030_v15 = vld [vmem:[#allocation8 + $0x18] sm:$0xff]   ;;  %v6032_v59 = vld [vmem:[#allocation8 + $0x60] sm:$0xff]  }
 0x259   :  { %v6012_v60 = vld [vmem:[#allocation7 + $0x5b0] ss:$20 sps:$4 sm:$0xff]  }
 0x25b   :  { %3671 = vmatpush1.bf16.msra.mxu1 %v5958_v61  ;;  %3800 = vmatpush1.bf16.msra.mxu0 %v5961_v62  ;;  %v6034_v61 = vld [vmem:[#allocation8 + $0x20] sm:$0xff]   ;;  %v6036_v62 = vld [vmem:[#allocation8 + $0x68] sm:$0xff]  }
 0x25c   :  { %3672 = vmatprep.subr.bf16.mxu1 %v5966_v63  ;;  %3801 = vmatprep.subr.bf16.mxu0 %v5969_v5  ;;  %v6013_v63 = vld [vmem:[#allocation7 + $0x5d8] ss:$20 sps:$4 sm:$0xff]   ;;  %v6014_v5 = vld [vmem:[#allocation7 + $0x600] ss:$20 sps:$4 sm:$0xff]  }
 0x25f   :  { %3673 = vmatpush1.bf16.msra.mxu1 %v5964_v12  ;;  %3802 = vmatpush1.bf16.msra.mxu0 %v5967_v0  ;;  %v6015_v12 = vld [vmem:[#allocation7 + $0x628] ss:$20 sps:$4 sm:$0xff]   ;;  %v6017_v0 = vld [vmem:[#allocation8 + $0xc0] sm:$0xff]  }
 0x260   :  { %3674 = vmatprep.subr.bf16.mxu1 %v5972_v1  ;;  %3803 = vmatprep.subr.bf16.mxu0 %v5975_v2  ;;  %v6019_v1 = vld [vmem:[#allocation8 + $0x80] sm:$0xff]   ;;  %v6021_v2 = vld [vmem:[#allocation8 + $0xc8] sm:$0xff]  }
 0x263   :  { %3675 = vmatpush1.bf16.msra.mxu1 %v5970_v3  ;;  %3804 = vmatpush1.bf16.msra.mxu0 %v5973_v6  ;;  %v6023_v3 = vld [vmem:[#allocation8 + $0x88] sm:$0xff]   ;;  %v6025_v6 = vld [vmem:[#allocation8 + $0xd0] sm:$0xff]  }
 0x264   :  { %5129 = vmatprep.subr.bf16.mxu1 %v5976_v16  ;;  %5151 = vmatprep.subr.bf16.mxu0 %v5977_v17  ;;  %v6027_v16 = vld [vmem:[#allocation8 + $0x90] sm:$0xff]   ;;  %v6029_v17 = vld [vmem:[#allocation8 + $0xd8] sm:$0xff]  }
 0x266   :  { %3693 = vmatmul.mubr.bf16.vlgmr.msra.gmra.mrb[12].mxu1 %v6433_v40  ;;  %3822 = vmatmul.mubr.bf16.vlgmr.msra.gmra.mrb[12].mxu0 %v6433_v40 }
 0x267   :  { %5130 = vmatpush3.bf16.msra.mxu1 %v5978_v18  ;;  %3864 = vmatprep.mubr.bf16.mxu1 %v6405_v45  ;;  %v5991_v45 = vld [vmem:[#allocation7 + $0x308] ss:$20 sps:$4 sm:$0xff]  }
 0x268   :  { %5152 = vmatpush3.bf16.msra.mxu0 %v5979_v19  ;;  %3905 = vmatprep.mubr.bf16.mxu0 %v6407_v46  ;;  %v5993_v46 = vld [vmem:[#allocation7 + $0x470] ss:$20 sps:$4 sm:$0xff]   ;;  %v6031_v18 = vld [vmem:[#allocation8 + $0x98] sm:$0xff]  }
 0x269   :  { %5131 = vmatprep.subr.bf16.mxu1 %v5980_v20  ;;  %5153 = vmatprep.subr.bf16.mxu0 %v5981_v21  ;;  %v6033_v19 = vld [vmem:[#allocation8 + $0xe0] sm:$0xff]   ;;  %v6037_v21 = vld [vmem:[#allocation8 + $0xe8] sm:$0xff]  }
 0x26a   :  { %v6035_v20 = vld [vmem:[#allocation8 + $0xa0] sm:$0xff]  }
 0x26b   :  { %5132 = vmatpush3.bf16.msra.mxu1 %v5982_v22  ;;  %v6038_v22 = vld [vmem:[#allocation8 + $0x28] sm:$0xff]  }
 0x26c   :  { %5154 = vmatpush3.bf16.msra.mxu0 %v5983_v23  ;;  %5133 = vmatprep.subr.bf16.mxu1 %v5984_v24  ;;  %v6040_v23 = vld [vmem:[#allocation8 + $0x70] sm:$0xff]  }
 0x26d   :  { %5155 = vmatprep.subr.bf16.mxu0 %v5985_v25  ;;  %v6041_v24 = vld [vmem:[#allocation8 + $0xf0] sm:$0xff]  }
 0x26e   :  { %v6042_v25 = vld [vmem:[#allocation8 + $0x30] sm:$0xff]  }
 0x26f   :  { %5134 = vmatpush3.bf16.msra.mxu1 %v5986_v26  ;;  %v6043_v26 = vld [vmem:[#allocation8 + $0xb0] sm:$0xff]  }
 0x270   :  { %5156 = vmatpush3.bf16.msra.mxu0 %v5987_v27  ;;  %5135 = vmatprep.subr.bf16.mxu1 %v5988_v28  ;;  %v6044_v27 = vld [vmem:[#allocation8 + $0x78] sm:$0xff]  }
 0x271   :  { %5157 = vmatprep.subr.bf16.mxu0 %v5989_v29  ;;  %v6045_v28 = vld [vmem:[#allocation8 + $0xf8] sm:$0xff]  }
 0x272   :  { %v6046_v29 = vld [vmem:[#allocation8 + $0x38] sm:$0xff]  }
 0x273   :  { %5136 = vmatpush3.bf16.msra.mxu1 %v5990_v31  ;;  %v6047_v31 = vld [vmem:[#allocation8 + $0xb8] sm:$0xff]  }
 0x274   :  { %5158 = vmatpush3.bf16.msra.mxu0 %v5991_v45  ;;  %5137 = vmatprep.subr.bf16.mxu1 %v5992_v32  ;;  %v2507_v45 = vld [vmem:[%s6509_s4] sm:$0x1f] }
 0x275   :  { %5159 = vmatprep.subr.bf16.mxu0 %v5993_v46  ;;  %v2512_v32 = vrot.slane %v2507_v45, %v408_v8  ;;  %v2520_v46 = vrot.slane %v2507_v45, %v416_v10 }
 0x277   :  { %5138 = vmatpush3.bf16.msra.mxu1 %v5994_v33  ;;  %v2516_v33 = vrot.slane %v2507_v45, %v412_v13 }
 0x278   :  { %5160 = vmatpush3.bf16.msra.mxu0 %v5995_v34  ;;  %5139 = vmatprep.subr.bf16.mxu1 %v5996_v35  ;;  %v2524_v34 = vrot.slane %v2507_v45, %v420_v14 }
 0x279   :  { %5161 = vmatprep.subr.bf16.mxu0 %v5997_v9 }
 0x27b   :  { %5140 = vmatpush3.bf16.msra.mxu1 %v5998_v11 }
 0x27c   :  { %5162 = vmatpush3.bf16.msra.mxu0 %v5999_v36  ;;  %5141 = vmatprep.subr.bf16.mxu1 %v6000_v30 }
 0x27d   :  { %5163 = vmatprep.subr.bf16.mxu0 %v6001_v37 }
 0x27f   :  { %5142 = vmatpush3.bf16.msra.mxu1 %v6002_v38 }
 0x280   :  { %5164 = vmatpush3.bf16.msra.mxu0 %v6003_v39  ;;  %5143 = vmatprep.subr.bf16.mxu1 %v6004_v41 }
 0x281   :  { %5165 = vmatprep.subr.bf16.mxu0 %v6005_v42 }
 0x283   :  { %5144 = vmatpush3.bf16.msra.mxu1 %v6006_v47 }
 0x284   :  { %5166 = vmatpush3.bf16.msra.mxu0 %v6007_v48  ;;  %5250 = vmatprep.subr.bf16.mxu1 %v6218_v53 }
 0x285   :  { %5182 = vmatprep.subr.bf16.mxu0 %v6016_v49 }
 0x286   :  { %3865 = vmatmul.mubr.bf16.vlgmr.msra.gmra.mrb[16].mxu1 %v6401_v43  ;;  %v6026_v43 = vld [vmem:[#allocation8 + $0x10] sm:$0xff]  }
 0x287   :  { %3906 = vmatmul.mubr.bf16.vlgmr.msra.gmra.mrb[16].mxu0 %v6403_v44  ;;  %5251 = vmatpush3.bf16.msra.mxu1 %v6008_v50  ;;  %v6011_v44 = vld [vmem:[#allocation7 + $0x588] ss:$20 sps:$4 sm:$0xff]  }
 0x288   :  { %5252 = vmatprep.subr.bf16.mxu1 %v6218_v53  ;;  %5266 = vmatprep.mubr.msk.bf16.mxu1 %vm6219_vm1, %v6218_v53 }
 0x289   :  { %5183 = vmatpush3.bf16.msra.mxu0 %v6018_v51 }
 0x28a   :  { %5184 = vmatprep.subr.bf16.mxu0 %v6020_v52 }
 0x28b   :  { %5253 = vmatpush3.bf16.msra.mxu1 %v6009_v54 }
 0x28c   :  { %5254 = vmatprep.subr.bf16.mxu1 %v6218_v53 }
 0x28d   :  { %5185 = vmatpush3.bf16.msra.mxu0 %v6022_v55 }
 0x28e   :  { %5186 = vmatprep.subr.bf16.mxu0 %v6024_v56 }
 0x28f   :  { %5255 = vmatpush3.bf16.msra.mxu1 %v6010_v57 }
 0x290   :  { %5256 = vmatprep.subr.bf16.mxu1 %v6218_v53 }
 0x291   :  { %5187 = vmatpush3.bf16.msra.mxu0 %v6026_v43 }
 0x292   :  { %5188 = vmatprep.subr.bf16.mxu0 %v6028_v58 }
 0x293   :  { %5257 = vmatpush3.bf16.msra.mxu1 %v6011_v44 }
 0x294   :  { %5258 = vmatprep.subr.bf16.mxu1 %v6218_v53 }
 0x295   :  { %5189 = vmatpush3.bf16.msra.mxu0 %v6030_v15 }
 0x296   :  { %5190 = vmatprep.subr.bf16.mxu0 %v6032_v59  ;;  %v6048_v59 = vld [vmem:[#allocation8 + $0x100] sm:$0xff]  }
 0x297   :  { %5259 = vmatpush3.bf16.msra.mxu1 %v6012_v60  ;;  %v6049_v60 = vld [vmem:[#allocation8 + $0x108] sm:$0xff]  }
 0x298   :  { %5260 = vmatprep.subr.bf16.mxu1 %v6218_v53 }
 0x299   :  { %5191 = vmatpush3.bf16.msra.mxu0 %v6034_v61  ;;  %v6050_v61 = vld [vmem:[#allocation8 + $0x110] sm:$0xff]  }
 0x29a   :  { %5192 = vmatprep.subr.bf16.mxu0 %v6036_v62  ;;  %v6051_v62 = vld [vmem:[#allocation8 + $0x118] sm:$0xff]  }
 0x29b   :  { %5261 = vmatpush3.bf16.msra.mxu1 %v6013_v63  ;;  %v6052_v63 = vld [vmem:[#allocation8 + $0x120] sm:$0xff]  }
 0x29c   :  { %5262 = vmatprep.subr.bf16.mxu1 %v6218_v53 }
 0x29d   :  { %5193 = vmatpush3.bf16.msra.mxu0 %v6038_v22 }
 0x29e   :  { %5194 = vmatprep.subr.bf16.mxu0 %v6040_v23  ;;  %v6055_v23 = vld [vmem:[#allocation8 + $0x138] sm:$0xff]  }
 0x29f   :  { %5263 = vmatpush3.bf16.msra.mxu1 %v6014_v5  ;;  %v6053_v5 = vld [vmem:[#allocation8 + $0x128] sm:$0xff]  }
 0x2a0   :  { %5264 = vmatprep.subr.bf16.mxu1 %v6218_v53 }
 0x2a1   :  { %5195 = vmatpush3.bf16.msra.mxu0 %v6042_v25 }
 0x2a2   :  { %5196 = vmatprep.subr.bf16.mxu0 %v6044_v27 }
 0x2a3   :  { %5265 = vmatpush3.bf16.msra.mxu1 %v6015_v12 }
 0x2a4   :  { %5204 = vmatprep.subr.bf16.mxu1 %v6017_v0  ;;  %v2528_v0 = vrot.slane %v2507_v45, %v424_v4 }
 0x2a5   :  { %5197 = vmatpush3.bf16.msra.mxu0 %v6046_v29 }
 0x2a6   :  { %5267 = vmatmul.mubr.bf16.vlgmr.msra.gmra.mrb[20].mxu1 %v6433_v40  ;;  %v6039_v40 = vld [vmem:[#allocation8 + $0xa8] sm:$0xff]   ;;  %5270 = vmatprep.subr.bf16.mxu0 %v6218_v53 }
 0x2a7   :  { %5205 = vmatpush3.bf16.msra.mxu1 %v6019_v1  ;;  %v6054_v1 = vld [vmem:[#allocation8 + $0x130] sm:$0xff]  }
 0x2a8   :  { %5206 = vmatprep.subr.bf16.mxu1 %v6021_v2 }
 0x2ab   :  { %5207 = vmatpush3.bf16.msra.mxu1 %v6023_v3 }
 0x2ac   :  { %5208 = vmatprep.subr.bf16.mxu1 %v6025_v6 }
 0x2af   :  { %5209 = vmatpush3.bf16.msra.mxu1 %v6027_v16 }
 0x2b0   :  { %5210 = vmatprep.subr.bf16.mxu1 %v6029_v17 }
 0x2b3   :  { %5211 = vmatpush3.bf16.msra.mxu1 %v6031_v18 }
 0x2b4   :  { %5212 = vmatprep.subr.bf16.mxu1 %v6033_v19 }
 0x2b7   :  { %5213 = vmatpush3.bf16.msra.mxu1 %v6035_v20 }
 0x2b8   :  { %5214 = vmatprep.subr.bf16.mxu1 %v6037_v21 }
 0x2bb   :  { %5215 = vmatpush3.bf16.msra.mxu1 %v6039_v40 }
 0x2bc   :  { %5216 = vmatprep.subr.bf16.mxu1 %v6041_v24 }
 0x2bf   :  { %5217 = vmatpush3.bf16.msra.mxu1 %v6043_v26 }
 0x2c0   :  { %5218 = vmatprep.subr.bf16.mxu1 %v6045_v28 }
 0x2c3   :  { %5219 = vmatpush3.bf16.msra.mxu1 %v6047_v31 }
 0x2c4   :  { %5290 = vmatprep.subr.bf16.mxu1 %v6218_v53 }
 0x339   :  { %v3694_v35 = vpop.f32.mrb[12].mxu1  ;;  %v3823_v9 = vpop.f32.mrb[12].mxu0 }
 0x33a   :  { %v5318_v11 = vadd.f32 %v3694_v35, %v2512_v32  ;;  %v5322_v36 = vadd.f32 %v3823_v9, %v2520_v46  ;;  %v3696_v30 = vpop.f32.mrb[13].mxu1  ;;  %v3825_v37 = vpop.f32.mrb[13].mxu0  ;;  %v6057_v35 = vld [vmem:[#allocation10 + $0x8] sm:$0xff]   ;;  %v6058_v9 = vld [vmem:[#allocation10 + $0x10] sm:$0xff]  }
 0x33b   :  { %v5319_v38 = vadd.f32 %v3696_v30, %v2516_v33  ;;  %v5323_v39 = vadd.f32 %v3825_v37, %v2524_v34  ;;  %v3698_v41 = vpop.f32.mrb[14].mxu1  ;;  %v3827_v42 = vpop.f32.mrb[14].mxu0  ;;  %v6061_v30 = vld [vmem:[#allocation10 + $0x28] sm:$0xff]   ;;  %v6062_v37 = vld [vmem:[#allocation10 + $0x30] sm:$0xff]  }
 0x33c   :  { %v5320_v8 = vadd.f32 %v3698_v41, %v2512_v32  ;;  %v5324_v47 = vadd.f32 %v3827_v42, %v2520_v46  ;;  %v3700_v48 = vpop.f32.mrb[15].mxu1  ;;  %v3829_v10 = vpop.f32.mrb[15].mxu0  ;;  %v3955_v13 = vmax.f32 %v5318_v11, 0.0  ;;  %v3957_v51 = vmax.f32 %v5322_v36, 0.0  ;;  %v6059_v11 = vld [vmem:[#allocation10 + $0x18] sm:$0xff]   ;;  %v6060_v36 = vld [vmem:[#allocation10 + $0x20] sm:$0xff]  }
 0x33d   :  { %v5321_v49 = vadd.f32 %v3700_v48, %v2516_v33  ;;  %v5325_v50 = vadd.f32 %v3829_v10, %v2524_v34  ;;  %v3956_v54 = vmax.f32 %v5319_v38, 0.0  ;;  %v3958_v55 = vmax.f32 %v5323_v39, 0.0  ;;  %v6056_v34 = vld [vmem:[#allocation10] sm:$0xff]   ;;  %v6063_v38 = vld [vmem:[#allocation10 + $0x38] sm:$0xff]  }
 0x33e   :  { %v3960_v52 = vmax.f32 %v5320_v8, 0.0  ;;  %v3962_v14 = vmax.f32 %v5324_v47, 0.0  ;;  %v5011_v42 = vld [vmem:[%s6511_s6] ss:$0 sm:$0xff] }
 0x33f   :  { %v3961_v56 = vmax.f32 %v5321_v49, 0.0  ;;  %v3963_v57 = vmax.f32 %v5325_v50, 0.0 }
 0x340   :  { %v3965_v43 = vpack.c.bf16 %v3960_v52, %v3955_v13  ;;  %v3967_v58 = vpack.c.bf16 %v3962_v14, %v3957_v51 }
 0x341   :  { %v3966_v44 = vpack.c.bf16 %v3961_v56, %v3956_v54  ;;  %v3968_v15 = vpack.c.bf16 %v3963_v57, %v3958_v55 }
 0x343   :  { %4329 = vmatprep.mubr.bf16.mxu0 %v3966_v44  ;;  %4370 = vmatprep.mubr.bf16.mxu1 %v3968_v15 }
 0x344   :  { %4330 = vmatmul.mubr.bf16.vlgmr.msra.gmra.mrb[20].mxu0 %v3965_v43  ;;  %4371 = vmatmul.mubr.bf16.vlgmr.msra.gmra.mrb[24].mxu1 %v3967_v58 }
 0x345   :  { %5271 = vmatpush3.bf16.msra.mxu0 %v6048_v59  ;;  %5286 = vmatprep.mubr.msk.bf16.mxu0 %vm6219_vm1, %v6218_v53 }
 0x346   :  { %5272 = vmatprep.subr.bf16.mxu0 %v6218_v53  ;;  %5306 = vmatprep.mubr.msk.bf16.mxu1 %vm6219_vm1, %v6218_v53 }
 0x347   :  { %5291 = vmatpush3.bf16.msra.mxu1 %v6056_v34 }
 0x348   :  { %5292 = vmatprep.subr.bf16.mxu1 %v6218_v53 }
 0x349   :  { %5273 = vmatpush3.bf16.msra.mxu0 %v6049_v60 }
 0x34a   :  { %5274 = vmatprep.subr.bf16.mxu0 %v6218_v53 }
 0x34b   :  { %5293 = vmatpush3.bf16.msra.mxu1 %v6057_v35 }
 0x34c   :  { %5294 = vmatprep.subr.bf16.mxu1 %v6218_v53 }
 0x34d   :  { %5275 = vmatpush3.bf16.msra.mxu0 %v6050_v61 }
 0x34e   :  { %5276 = vmatprep.subr.bf16.mxu0 %v6218_v53 }
 0x34f   :  { %5295 = vmatpush3.bf16.msra.mxu1 %v6058_v9 }
 0x350   :  { %5296 = vmatprep.subr.bf16.mxu1 %v6218_v53 }
 0x351   :  { %5277 = vmatpush3.bf16.msra.mxu0 %v6051_v62 }
 0x352   :  { %5278 = vmatprep.subr.bf16.mxu0 %v6218_v53 }
 0x353   :  { %5297 = vmatpush3.bf16.msra.mxu1 %v6059_v11 }
 0x354   :  { %5298 = vmatprep.subr.bf16.mxu1 %v6218_v53 }
 0x355   :  { %5279 = vmatpush3.bf16.msra.mxu0 %v6052_v63  ;;  %v5052_v63 = vld [vmem:[%s6513_s8] ss:$0 sm:$0xff] }
 0x356   :  { %5280 = vmatprep.subr.bf16.mxu0 %v6218_v53 }
 0x357   :  { %5299 = vmatpush3.bf16.msra.mxu1 %v6060_v36 }
 0x358   :  { %5300 = vmatprep.subr.bf16.mxu1 %v6218_v53 }
 0x359   :  { %v5145_v12 = vpop.f32.mrb[16].mxu1  ;;  %5281 = vmatpush3.bf16.msra.mxu0 %v6053_v5 }
 0x35a   :  { %v5167_v2 = vpop.f32.mrb[16].mxu0  ;;  %v5146_v3 = vpop.f32.mrb[17].mxu1  ;;  %5282 = vmatprep.subr.bf16.mxu0 %v6218_v53 }
 0x35b   :  { %v5147_v6 = vadd.f32 %v5146_v3, %v5145_v12  ;;  %v5168_v16 = vpop.f32.mrb[17].mxu0  ;;  %v5148_v17 = vpop.f32.mrb[18].mxu1  ;;  %5301 = vmatpush3.bf16.msra.mxu1 %v6061_v30 }
 0x35c   :  { %v5169_v18 = vadd.f32 %v5168_v16, %v5167_v2  ;;  %v5170_v19 = vpop.f32.mrb[18].mxu0  ;;  %v5149_v20 = vpop.f32.mrb[19].mxu1  ;;  %5302 = vmatprep.subr.bf16.mxu1 %v6218_v53 }
 0x35d   :  { %v3867_v21 = vadd.f32 %v5147_v6, %v2528_v0  ;;  %v5150_v22 = vadd.f32 %v5149_v20, %v5148_v17  ;;  %v5171_v40 = vpop.f32.mrb[19].mxu0  ;;  %5283 = vmatpush3.bf16.msra.mxu0 %v6054_v1 }
 0x35e   :  { %v5172_v24 = vadd.f32 %v5171_v40, %v5170_v19  ;;  %5284 = vmatprep.subr.bf16.mxu0 %v6218_v53 }
 0x35f   :  { %v3870_v7 = vadd.f32 %v5150_v22, %v2528_v0  ;;  %v3908_v4 = vadd.f32 %v5169_v18, %v3867_v21  ;;  %5303 = vmatpush3.bf16.msra.mxu1 %v6062_v37 }
 0x360   :  { %5304 = vmatprep.subr.bf16.mxu1 %v6218_v53 }
 0x361   :  { %v3911_v25 = vadd.f32 %v5172_v24, %v3870_v7  ;;  %5285 = vmatpush3.bf16.msra.mxu0 %v6055_v23 }
 0x363   :  { %5305 = vmatpush3.bf16.msra.mxu1 %v6063_v38 }
 0x379   :  { %v3948_v26 = vpop.f32.mrb[20].mxu1 }
 0x37a   :  { %v3949_v27 = vadd.f32 %v3948_v26, %v3908_v4  ;;  %v5268_v28 = vpop.f32.mrb[21].mxu1 }
 0x37b   :  { %v3951_v29 = vpop.f32.mrb[22].mxu1 }
 0x37c   :  { %v3952_v31 = vadd.f32 %v3951_v29, %v3911_v25  ;;  %v5269_v45 = vpop.f32.mrb[23].mxu1  ;;  %v3959_v32 = vmax.f32 %v3949_v27, 0.0 }
 0x37e   :  { %v3964_v46 = vmax.f32 %v3952_v31, 0.0 }
 0x380   :  { %v3969_v33 = vpack.c.bf16 %v3964_v46, %v3959_v32 }
 0x382   :  { %5287 = vmatmul.mubr.bf16.vlgmr.msra.gmra.mrb[24].mxu0 %v3969_v33 }
 0x417   :  { %v5198_v39 = vpop.f32.mrb[20].mxu0  ;;  %v5220_v41 = vpop.f32.mrb[24].mxu1 }
 0x418   :  { %v5199_v8 = vpop.f32.mrb[21].mxu0  ;;  %v5221_v47 = vpop.f32.mrb[25].mxu1 }
 0x419   :  { %v5200_v48 = vadd.f32 %v5199_v8, %v5198_v39  ;;  %v5222_v10 = vadd.f32 %v5221_v47, %v5220_v41  ;;  %v5201_v49 = vpop.f32.mrb[22].mxu0  ;;  %v5223_v50 = vpop.f32.mrb[26].mxu1 }
 0x41a   :  { %v5202_v13 = vpop.f32.mrb[23].mxu0  ;;  %v5224_v51 = vpop.f32.mrb[27].mxu1 }
 0x41b   :  { %v4332_v52 = vadd.f32 %v5200_v48, %v5011_v42  ;;  %v5203_v14 = vadd.f32 %v5202_v13, %v5201_v49  ;;  %v5225_v54 = vadd.f32 %v5224_v51, %v5223_v50 }
 0x41d   :  { %v4335_v53 = vadd.f32 %v5203_v14, %v5011_v42  ;;  %v4373_v55 = vadd.f32 %v5222_v10, %v4332_v52 }
 0x41f   :  { %v4376_v56 = vadd.f32 %v5225_v54, %v4335_v53 }
 0x455   :  { %v4413_v57 = vpop.f32.mrb[24].mxu0 }
 0x456   :  { %v4414_v43 = vadd.f32 %v4413_v57, %v4373_v55  ;;  %v5288_v58 = vpop.f32.mrb[25].mxu0 }
 0x457   :  { %v4416_v44 = vpop.f32.mrb[26].mxu0 }
 0x458   :  { %v4417_v15 = vadd.f32 %v4416_v44, %v4376_v56  ;;  %v5289_v59 = vpop.f32.mrb[27].mxu0  ;;  %v4420_v60 = vmax.f32 %v4414_v43, 0.0 }
 0x45a   :  { %v4421_v61 = vmax.f32 %v4417_v15, 0.0 }
 0x45c   :  { %v4422_v62 = vpack.c.bf16 %v4421_v61, %v4420_v60 }
 0x45e   :  { %5307 = vmatmul.mubr.bf16.vlgmr.msra.gmra.mrb[28].mxu1 %v4422_v62 }
 0x531   :  { %v4528_v5 = vpop.f32.mrb[28].mxu1 }
 0x532   :  { %v4529_v12 = vadd.f32 %v5052_v63, %v4528_v5  ;;  %v5308_v0 = vpop.f32.mrb[29].mxu1 }
 0x533   :  { %v4531_v1 = vpop.f32.mrb[30].mxu1 }
 0x534   :  { %4535 = vst [vmem:[#allocation11] sm:$0xff] %v4529_v12  ;;  %v4532_v2 = vadd.f32 %v5052_v63, %v4531_v1  ;;  %v5309_v3 = vpop.f32.mrb[31].mxu1 }
 0x536   :  { %4536 = vst [vmem:[#allocation11 + $0x8] sm:$0xff] %v4532_v2 }
 0x537   :  { %6187 = shalt.err (!%p6184_p2)
}
 0x538   :  { %s6188_s18 = scalar_lea.hbm %s6514_s9, 256 }
 0x539   :  { %p6189_p3 = scmp.ne.s32.totalorder %s6514_s9, %s6188_s18  ;;  %p6192_p4 = scmp.lt.u32.totalorder %s6188_s18, %s6514_s9 }
 0x53b   :  { %p6194_p5 = pnand %p6192_p4, %p6189_p3 }
 0x53d   :  { %6197 = shalt.err (!%p6194_p5)
}
 0x53e   :  { %s6221_s16 = smov 128   ;;  %s6222_s25 = smov 8  }
 0x53f   :  { %4548 = dma.vmem_to_hbm [thread:$0]  %s4543_s14, 256, %s6514_s9, [#allocation4], %s6221_s16, %s6221_s16, %s6222_s25  }
 0x540   :  { %6204 = dma.done.wait [#allocation4], 256  }
 0x541   :  { %6205 = vsyncadd [#allocation4], 4294967040 }
 0x542   :  { %4552 = vsyncpa [#allocation3], 1 }
 0x543   :  { %4553 = vsyncpa [#allocation6], 1 }
 0x544   :  { %4554 = vsyncpa [#allocation9], 1 }
 0x545   :  { %4555 = vsyncpa [#allocation4], 1 }

</bundles_post_ra>
